<compile_context>
chip_gen: v7x
topology: tpu7x:2x2x1
jax: 0.10.0
libtpu: 0.0.40
codegen_flags: <defaults>
</compile_context>

<pallas_src>
import numpy as np
import jax
import jax.numpy as jnp
from jax.experimental import pallas as pl
from jax.experimental.pallas import tpu as pltpu

# ---- model hyper-params (mirrors SBModel_test.__init__ / forward) ----------
C_CH = 4          # image channels (small synthetic choice)
H = 16
W_SP = 16
NGF = 64          # self.ngf = 64
Z_DIM = 4 * NGF   # z = randn([bs, 4*ngf]) -> 256
TAU = 0.01        # tau used inside forward()
T_STEPS = 5       # self.T = 5


# -----------------------------------------------------------------------------
# Fused kernel: all T SB timesteps in ONE invocation (no grid), statically
# unrolled.  Per step t:
#   Xt   <- (1-inter)*Xt + inter*Xt_1 + sqrt(scale*tau)*noise[t-1]   (t > 0)
#   Xt_1 <- tanh(W_eff[t] @ Xt + b_eff[t])          (FiLM folded on the host)
# -----------------------------------------------------------------------------
def sb_fused_kernel(x0_ref,       # VMEM (C, P)        real_A, lane-dense
                    noise_ref,    # VMEM (T-1, C, P)   host-generated noise
                    coef_ref,     # SMEM (3*(T-1),)    [1-inter, inter, sigma]
                    w_ref,        # SMEM (T*C*C,)      folded 1x1-conv weights
                    b_ref,        # SMEM (T*C,)        folded 1x1-conv bias
                    fakes_ref):   # VMEM (T, C, P)     fake_{t+1} for each step
    xt = x0_ref[...]              # Xt carried as a local value (no scratch)
    xt1 = None                    # Xt_1 (generator output of previous step)

    for t in range(T_STEPS):      # statically unrolled: one kernel invocation
        if t > 0:
            alpha = coef_ref[3 * (t - 1) + 0]      # 1 - inter
            inter = coef_ref[3 * (t - 1) + 1]
            sigma = coef_ref[3 * (t - 1) + 2]      # sqrt(scale * tau)
            xt = alpha * xt + inter * xt1 + sigma * noise_ref[t - 1]

        # Generator stand-in (FiLM-folded 1x1 conv + tanh) on the VPU:
        # unrolled 4x4 scalar-broadcast multiply-accumulate (exact f32,
        # no MXU push), scalars read from SMEM.
        rows = []
        for co in range(C_CH):
            base = (t * C_CH + co) * C_CH
            acc = w_ref[base + 0] * xt[0:1, :]
            for ci in range(1, C_CH):
                acc = acc + w_ref[base + ci] * xt[ci:ci + 1, :]
            rows.append(acc + b_ref[t * C_CH + co])
        gen = jnp.tanh(jnp.concatenate(rows, axis=0))       # (C, P)

        xt1 = gen
        fakes_ref[t] = gen        # VMEM store; whole (T,C,P) block flushed once


# -----------------------------------------------------------------------------
# Forward pass of SBModel_test (T-step iterative refinement, one kernel launch).
# -----------------------------------------------------------------------------
def sb_forward(real_A, key, params):
    w, b, wzg, wzb, wtg, wtb = params
    N, Cc, Hh, Ww = real_A.shape
    P = N * Hh * Ww

    # NCHW -> lane-dense [C, P]
    x0 = jnp.transpose(real_A, (1, 0, 2, 3)).reshape(Cc, P)

    # time schedule exactly as in the PyTorch forward() (compile-time numpy)
    incs = np.array([0] + [1 / (i + 1) for i in range(T_STEPS - 1)])
    times = np.cumsum(incs)
    times = times / times[-1]
    times = 0.5 * times[-1] + 0.5 * times

    # per-step blend coefficients (t = 1..T-1), precomputed on the host:
    #   (alpha = 1 - inter, inter, sigma = sqrt(scale * tau))
    coeffs = np.zeros((T_STEPS - 1, 3), np.float32)
    for t in range(1, T_STEPS):
        delta = times[t] - times[t - 1]
        denom = times[-1] - times[t - 1]
        inter = delta / denom
        scale = delta * (1.0 - delta / denom)
        coeffs[t - 1] = (1.0 - inter, inter, np.sqrt(scale * TAU))
    coef_flat = jnp.asarray(coeffs.reshape(-1))                     # (3*(T-1),)

    # host-side RNG (replaces torch.randn / torch.randn_like)
    key, k_z, k_n = jax.random.split(key, 3)
    z = jax.random.normal(k_z, (T_STEPS, Z_DIM), jnp.float32)       # (T, 256)
    noise = jax.random.normal(k_n, (T_STEPS - 1, Cc, P), jnp.float32)

    # FiLM params from (z, time), folded into per-step effective conv weights.
    # NOTE: valid for N == 1 (single image), as enforced by data_dependent_initialize.
    t_col = jnp.asarray(times, jnp.float32)[:, None]                # (T, 1)
    gamma = z @ wzg + t_col * wtg                                   # (T, C)
    beta = z @ wzb + t_col * wtb                                    # (T, C)
    w_eff = (1.0 + gamma)[:, :, None] * w.T[None, :, :]             # (T, Cout, Cin)
    b_eff = (1.0 + gamma) * b + beta                                # (T, C)
    w_flat = w_eff.reshape(-1)                                      # (T*C*C,) = 80
    b_flat = b_eff.reshape(-1)                                      # (T*C,)   = 20

    fakes_cp = pl.pallas_call(
        sb_fused_kernel,
        out_shape=jax.ShapeDtypeStruct((T_STEPS, Cc, P), jnp.float32),
        in_specs=[
            pl.BlockSpec(memory_space=pltpu.MemorySpace.VMEM),   # x0     (C, P)
            pl.BlockSpec(memory_space=pltpu.MemorySpace.VMEM),   # noise  (T-1, C, P)
            pl.BlockSpec(memory_space=pltpu.MemorySpace.SMEM),   # coeffs (flat)
            pl.BlockSpec(memory_space=pltpu.MemorySpace.SMEM),   # w_eff  (flat)
            pl.BlockSpec(memory_space=pltpu.MemorySpace.SMEM),   # b_eff  (flat)
        ],
        out_specs=pl.BlockSpec(memory_space=pltpu.MemorySpace.VMEM),
    )(x0, noise, coef_flat, w_flat, b_flat)

    # single reshape/transpose back to NCHW for all T steps (stacked, no list)
    fakes = jnp.transpose(fakes_cp.reshape(T_STEPS, Cc, N, Hh, Ww),
                          (0, 2, 1, 3, 4))                          # (T, N, C, H, W)
    xt1 = fakes[-1]                                                 # final Xt_1
    return fakes, xt1


def init_params(key):
    ks = jax.random.split(key, 6)
    w = jax.random.normal(ks[0], (C_CH, C_CH), jnp.float32) * 0.5
    b = jax.random.normal(ks[1], (1, C_CH), jnp.float32) * 0.1
    wzg = jax.random.normal(ks[2], (Z_DIM, C_CH), jnp.float32) * 0.02
    wzb = jax.random.normal(ks[3], (Z_DIM, C_CH), jnp.float32) * 0.02
    wtg = jax.random.normal(ks[4], (1, C_CH), jnp.float32) * 0.1
    wtb = jax.random.normal(ks[5], (1, C_CH), jnp.float32) * 0.1
    return (w, b, wzg, wzb, wtg, wtb)


if __name__ == "__main__":
    root = jax.random.PRNGKey(0)
    k_param, k_data, k_fwd = jax.random.split(root, 3)

    params = init_params(k_param)

    # data_dependent_initialize trims to bs = 1
    real_A = jax.random.normal(k_data, (1, C_CH, H, W_SP), jnp.float32)

    fwd = jax.jit(sb_forward)
    fakes, xt1 = fwd(real_A, k_fwd, params)
    jax.block_until_ready((fakes, xt1))

    assert fakes.shape == (T_STEPS, 1, C_CH, H, W_SP)
    assert xt1.shape == real_A.shape
    assert bool(jnp.isfinite(fakes).all())
    assert bool(jnp.isfinite(xt1).all())
    print("KERNEL_OK")
</pallas_src>

<mosaic_0001>
module attributes {stable_mosaic.version = 11 : i64} {
  func.func @sb_fused_kernel(%arg0: memref<4x256xf32, #tpu.memory_space<vmem>>, %arg1: memref<4x4x256xf32, #tpu.memory_space<vmem>>, %arg2: memref<12xf32, #tpu.memory_space<smem>>, %arg3: memref<80xf32, #tpu.memory_space<smem>>, %arg4: memref<20xf32, #tpu.memory_space<smem>>, %arg5: memref<5x4x256xf32, #tpu.memory_space<vmem>>) attributes {dimension_semantics = [], scalar_prefetch = 0 : i64, scratch_operands = 0 : i64, tpu.core_type = #tpu.core_type<tc>} {
    %c0 = arith.constant 0 : index
    %c0_0 = arith.constant 0 : index
    %0 = vector.load %arg0[%c0, %c0_0] : memref<4x256xf32, #tpu.memory_space<vmem>>, vector<4x256xf32>
    %c0_1 = arith.constant 0 : index
    %1 = memref.load %arg3[%c0_1] : memref<80xf32, #tpu.memory_space<smem>>
    %2 = vector.extract_strided_slice %0 {offsets = [0, 0], sizes = [1, 256], strides = [1, 1]} : vector<4x256xf32> to vector<1x256xf32>
    %3 = vector.broadcast %1 : f32 to vector<1x256xf32>
    %4 = arith.mulf %3, %2 : vector<1x256xf32>
    %c1 = arith.constant 1 : index
    %5 = memref.load %arg3[%c1] : memref<80xf32, #tpu.memory_space<smem>>
    %6 = vector.extract_strided_slice %0 {offsets = [1, 0], sizes = [1, 256], strides = [1, 1]} : vector<4x256xf32> to vector<1x256xf32>
    %7 = vector.broadcast %5 : f32 to vector<1x256xf32>
    %8 = arith.mulf %7, %6 : vector<1x256xf32>
    %9 = arith.addf %4, %8 : vector<1x256xf32>
    %c2 = arith.constant 2 : index
    %10 = memref.load %arg3[%c2] : memref<80xf32, #tpu.memory_space<smem>>
    %11 = vector.extract_strided_slice %0 {offsets = [2, 0], sizes = [1, 256], strides = [1, 1]} : vector<4x256xf32> to vector<1x256xf32>
    %12 = vector.broadcast %10 : f32 to vector<1x256xf32>
    %13 = arith.mulf %12, %11 : vector<1x256xf32>
    %14 = arith.addf %9, %13 : vector<1x256xf32>
    %c3 = arith.constant 3 : index
    %15 = memref.load %arg3[%c3] : memref<80xf32, #tpu.memory_space<smem>>
    %16 = vector.extract_strided_slice %0 {offsets = [3, 0], sizes = [1, 256], strides = [1, 1]} : vector<4x256xf32> to vector<1x256xf32>
    %17 = vector.broadcast %15 : f32 to vector<1x256xf32>
    %18 = arith.mulf %17, %16 : vector<1x256xf32>
    %19 = arith.addf %14, %18 : vector<1x256xf32>
    %c0_2 = arith.constant 0 : index
    %20 = memref.load %arg4[%c0_2] : memref<20xf32, #tpu.memory_space<smem>>
    %21 = vector.broadcast %20 : f32 to vector<1x256xf32>
    %22 = arith.addf %19, %21 : vector<1x256xf32>
    %c4 = arith.constant 4 : index
    %23 = memref.load %arg3[%c4] : memref<80xf32, #tpu.memory_space<smem>>
    %24 = vector.extract_strided_slice %0 {offsets = [0, 0], sizes = [1, 256], strides = [1, 1]} : vector<4x256xf32> to vector<1x256xf32>
    %25 = vector.broadcast %23 : f32 to vector<1x256xf32>
    %26 = arith.mulf %25, %24 : vector<1x256xf32>
    %c5 = arith.constant 5 : index
    %27 = memref.load %arg3[%c5] : memref<80xf32, #tpu.memory_space<smem>>
    %28 = vector.extract_strided_slice %0 {offsets = [1, 0], sizes = [1, 256], strides = [1, 1]} : vector<4x256xf32> to vector<1x256xf32>
    %29 = vector.broadcast %27 : f32 to vector<1x256xf32>
    %30 = arith.mulf %29, %28 : vector<1x256xf32>
    %31 = arith.addf %26, %30 : vector<1x256xf32>
    %c6 = arith.constant 6 : index
    %32 = memref.load %arg3[%c6] : memref<80xf32, #tpu.memory_space<smem>>
    %33 = vector.extract_strided_slice %0 {offsets = [2, 0], sizes = [1, 256], strides = [1, 1]} : vector<4x256xf32> to vector<1x256xf32>
    %34 = vector.broadcast %32 : f32 to vector<1x256xf32>
    %35 = arith.mulf %34, %33 : vector<1x256xf32>
    %36 = arith.addf %31, %35 : vector<1x256xf32>
    %c7 = arith.constant 7 : index
    %37 = memref.load %arg3[%c7] : memref<80xf32, #tpu.memory_space<smem>>
    %38 = vector.extract_strided_slice %0 {offsets = [3, 0], sizes = [1, 256], strides = [1, 1]} : vector<4x256xf32> to vector<1x256xf32>
    %39 = vector.broadcast %37 : f32 to vector<1x256xf32>
    %40 = arith.mulf %39, %38 : vector<1x256xf32>
    %41 = arith.addf %36, %40 : vector<1x256xf32>
    %c1_3 = arith.constant 1 : index
    %42 = memref.load %arg4[%c1_3] : memref<20xf32, #tpu.memory_space<smem>>
    %43 = vector.broadcast %42 : f32 to vector<1x256xf32>
    %44 = arith.addf %41, %43 : vector<1x256xf32>
    %c8 = arith.constant 8 : index
    %45 = memref.load %arg3[%c8] : memref<80xf32, #tpu.memory_space<smem>>
    %46 = vector.extract_strided_slice %0 {offsets = [0, 0], sizes = [1, 256], strides = [1, 1]} : vector<4x256xf32> to vector<1x256xf32>
    %47 = vector.broadcast %45 : f32 to vector<1x256xf32>
    %48 = arith.mulf %47, %46 : vector<1x256xf32>
    %c9 = arith.constant 9 : index
    %49 = memref.load %arg3[%c9] : memref<80xf32, #tpu.memory_space<smem>>
    %50 = vector.extract_strided_slice %0 {offsets = [1, 0], sizes = [1, 256], strides = [1, 1]} : vector<4x256xf32> to vector<1x256xf32>
    %51 = vector.broadcast %49 : f32 to vector<1x256xf32>
    %52 = arith.mulf %51, %50 : vector<1x256xf32>
    %53 = arith.addf %48, %52 : vector<1x256xf32>
    %c10 = arith.constant 10 : index
    %54 = memref.load %arg3[%c10] : memref<80xf32, #tpu.memory_space<smem>>
    %55 = vector.extract_strided_slice %0 {offsets = [2, 0], sizes = [1, 256], strides = [1, 1]} : vector<4x256xf32> to vector<1x256xf32>
    %56 = vector.broadcast %54 : f32 to vector<1x256xf32>
    %57 = arith.mulf %56, %55 : vector<1x256xf32>
    %58 = arith.addf %53, %57 : vector<1x256xf32>
    %c11 = arith.constant 11 : index
    %59 = memref.load %arg3[%c11] : memref<80xf32, #tpu.memory_space<smem>>
    %60 = vector.extract_strided_slice %0 {offsets = [3, 0], sizes = [1, 256], strides = [1, 1]} : vector<4x256xf32> to vector<1x256xf32>
    %61 = vector.broadcast %59 : f32 to vector<1x256xf32>
    %62 = arith.mulf %61, %60 : vector<1x256xf32>
    %63 = arith.addf %58, %62 : vector<1x256xf32>
    %c2_4 = arith.constant 2 : index
    %64 = memref.load %arg4[%c2_4] : memref<20xf32, #tpu.memory_space<smem>>
    %65 = vector.broadcast %64 : f32 to vector<1x256xf32>
    %66 = arith.addf %63, %65 : vector<1x256xf32>
    %c12 = arith.constant 12 : index
    %67 = memref.load %arg3[%c12] : memref<80xf32, #tpu.memory_space<smem>>
    %68 = vector.extract_strided_slice %0 {offsets = [0, 0], sizes = [1, 256], strides = [1, 1]} : vector<4x256xf32> to vector<1x256xf32>
    %69 = vector.broadcast %67 : f32 to vector<1x256xf32>
    %70 = arith.mulf %69, %68 : vector<1x256xf32>
    %c13 = arith.constant 13 : index
    %71 = memref.load %arg3[%c13] : memref<80xf32, #tpu.memory_space<smem>>
    %72 = vector.extract_strided_slice %0 {offsets = [1, 0], sizes = [1, 256], strides = [1, 1]} : vector<4x256xf32> to vector<1x256xf32>
    %73 = vector.broadcast %71 : f32 to vector<1x256xf32>
    %74 = arith.mulf %73, %72 : vector<1x256xf32>
    %75 = arith.addf %70, %74 : vector<1x256xf32>
    %c14 = arith.constant 14 : index
    %76 = memref.load %arg3[%c14] : memref<80xf32, #tpu.memory_space<smem>>
    %77 = vector.extract_strided_slice %0 {offsets = [2, 0], sizes = [1, 256], strides = [1, 1]} : vector<4x256xf32> to vector<1x256xf32>
    %78 = vector.broadcast %76 : f32 to vector<1x256xf32>
    %79 = arith.mulf %78, %77 : vector<1x256xf32>
    %80 = arith.addf %75, %79 : vector<1x256xf32>
    %c15 = arith.constant 15 : index
    %81 = memref.load %arg3[%c15] : memref<80xf32, #tpu.memory_space<smem>>
    %82 = vector.extract_strided_slice %0 {offsets = [3, 0], sizes = [1, 256], strides = [1, 1]} : vector<4x256xf32> to vector<1x256xf32>
    %83 = vector.broadcast %81 : f32 to vector<1x256xf32>
    %84 = arith.mulf %83, %82 : vector<1x256xf32>
    %85 = arith.addf %80, %84 : vector<1x256xf32>
    %c3_5 = arith.constant 3 : index
    %86 = memref.load %arg4[%c3_5] : memref<20xf32, #tpu.memory_space<smem>>
    %87 = vector.broadcast %86 : f32 to vector<1x256xf32>
    %88 = arith.addf %85, %87 : vector<1x256xf32>
    %89 = tpu.concatenate %22, %44, %66, %88 in 0 : vector<1x256xf32>, vector<1x256xf32>, vector<1x256xf32>, vector<1x256xf32> -> vector<4x256xf32>
    %90 = math.tanh %89 : vector<4x256xf32>
    %c0_6 = arith.constant 0 : index
    %c0_7 = arith.constant 0 : index
    %c0_8 = arith.constant 0 : index
    %91 = vector.load %arg5[%c0_6, %c0_7, %c0_8] : memref<5x4x256xf32, #tpu.memory_space<vmem>>, vector<1x4x256xf32>
    %92 = vector.shape_cast %91 : vector<1x4x256xf32> to vector<4x256xf32>
    %93 = vector.shape_cast %90 : vector<4x256xf32> to vector<1x4x256xf32>
    tpu.vector_store %arg5[%c0_6, %c0_7, %c0_8], %93 {strides = array<i32>} : memref<5x4x256xf32, #tpu.memory_space<vmem>>, vector<1x4x256xf32>,
    %c0_9 = arith.constant 0 : index
    %94 = memref.load %arg2[%c0_9] : memref<12xf32, #tpu.memory_space<smem>>
    %c1_10 = arith.constant 1 : index
    %95 = memref.load %arg2[%c1_10] : memref<12xf32, #tpu.memory_space<smem>>
    %c2_11 = arith.constant 2 : index
    %96 = memref.load %arg2[%c2_11] : memref<12xf32, #tpu.memory_space<smem>>
    %97 = vector.broadcast %94 : f32 to vector<4x256xf32>
    %98 = arith.mulf %97, %0 : vector<4x256xf32>
    %99 = vector.broadcast %95 : f32 to vector<4x256xf32>
    %100 = arith.mulf %99, %90 : vector<4x256xf32>
    %101 = arith.addf %98, %100 : vector<4x256xf32>
    %c0_12 = arith.constant 0 : index
    %c0_13 = arith.constant 0 : index
    %c0_14 = arith.constant 0 : index
    %102 = vector.load %arg1[%c0_12, %c0_13, %c0_14] : memref<4x4x256xf32, #tpu.memory_space<vmem>>, vector<1x4x256xf32>
    %103 = vector.shape_cast %102 : vector<1x4x256xf32> to vector<4x256xf32>
    %104 = vector.broadcast %96 : f32 to vector<4x256xf32>
    %105 = arith.mulf %104, %103 : vector<4x256xf32>
    %106 = arith.addf %101, %105 : vector<4x256xf32>
    %c16 = arith.constant 16 : index
    %107 = memref.load %arg3[%c16] : memref<80xf32, #tpu.memory_space<smem>>
    %108 = vector.extract_strided_slice %106 {offsets = [0, 0], sizes = [1, 256], strides = [1, 1]} : vector<4x256xf32> to vector<1x256xf32>
    %109 = vector.broadcast %107 : f32 to vector<1x256xf32>
    %110 = arith.mulf %109, %108 : vector<1x256xf32>
    %c17 = arith.constant 17 : index
    %111 = memref.load %arg3[%c17] : memref<80xf32, #tpu.memory_space<smem>>
    %112 = vector.extract_strided_slice %106 {offsets = [1, 0], sizes = [1, 256], strides = [1, 1]} : vector<4x256xf32> to vector<1x256xf32>
    %113 = vector.broadcast %111 : f32 to vector<1x256xf32>
    %114 = arith.mulf %113, %112 : vector<1x256xf32>
    %115 = arith.addf %110, %114 : vector<1x256xf32>
    %c18 = arith.constant 18 : index
    %116 = memref.load %arg3[%c18] : memref<80xf32, #tpu.memory_space<smem>>
    %117 = vector.extract_strided_slice %106 {offsets = [2, 0], sizes = [1, 256], strides = [1, 1]} : vector<4x256xf32> to vector<1x256xf32>
    %118 = vector.broadcast %116 : f32 to vector<1x256xf32>
    %119 = arith.mulf %118, %117 : vector<1x256xf32>
    %120 = arith.addf %115, %119 : vector<1x256xf32>
    %c19 = arith.constant 19 : index
    %121 = memref.load %arg3[%c19] : memref<80xf32, #tpu.memory_space<smem>>
    %122 = vector.extract_strided_slice %106 {offsets = [3, 0], sizes = [1, 256], strides = [1, 1]} : vector<4x256xf32> to vector<1x256xf32>
    %123 = vector.broadcast %121 : f32 to vector<1x256xf32>
    %124 = arith.mulf %123, %122 : vector<1x256xf32>
    %125 = arith.addf %120, %124 : vector<1x256xf32>
    %c4_15 = arith.constant 4 : index
    %126 = memref.load %arg4[%c4_15] : memref<20xf32, #tpu.memory_space<smem>>
    %127 = vector.broadcast %126 : f32 to vector<1x256xf32>
    %128 = arith.addf %125, %127 : vector<1x256xf32>
    %c20 = arith.constant 20 : index
    %129 = memref.load %arg3[%c20] : memref<80xf32, #tpu.memory_space<smem>>
    %130 = vector.extract_strided_slice %106 {offsets = [0, 0], sizes = [1, 256], strides = [1, 1]} : vector<4x256xf32> to vector<1x256xf32>
    %131 = vector.broadcast %129 : f32 to vector<1x256xf32>
    %132 = arith.mulf %131, %130 : vector<1x256xf32>
    %c21 = arith.constant 21 : index
    %133 = memref.load %arg3[%c21] : memref<80xf32, #tpu.memory_space<smem>>
    %134 = vector.extract_strided_slice %106 {offsets = [1, 0], sizes = [1, 256], strides = [1, 1]} : vector<4x256xf32> to vector<1x256xf32>
    %135 = vector.broadcast %133 : f32 to vector<1x256xf32>
    %136 = arith.mulf %135, %134 : vector<1x256xf32>
    %137 = arith.addf %132, %136 : vector<1x256xf32>
    %c22 = arith.constant 22 : index
    %138 = memref.load %arg3[%c22] : memref<80xf32, #tpu.memory_space<smem>>
    %139 = vector.extract_strided_slice %106 {offsets = [2, 0], sizes = [1, 256], strides = [1, 1]} : vector<4x256xf32> to vector<1x256xf32>
    %140 = vector.broadcast %138 : f32 to vector<1x256xf32>
    %141 = arith.mulf %140, %139 : vector<1x256xf32>
    %142 = arith.addf %137, %141 : vector<1x256xf32>
    %c23 = arith.constant 23 : index
    %143 = memref.load %arg3[%c23] : memref<80xf32, #tpu.memory_space<smem>>
    %144 = vector.extract_strided_slice %106 {offsets = [3, 0], sizes = [1, 256], strides = [1, 1]} : vector<4x256xf32> to vector<1x256xf32>
    %145 = vector.broadcast %143 : f32 to vector<1x256xf32>
    %146 = arith.mulf %145, %144 : vector<1x256xf32>
    %147 = arith.addf %142, %146 : vector<1x256xf32>
    %c5_16 = arith.constant 5 : index
    %148 = memref.load %arg4[%c5_16] : memref<20xf32, #tpu.memory_space<smem>>
    %149 = vector.broadcast %148 : f32 to vector<1x256xf32>
    %150 = arith.addf %147, %149 : vector<1x256xf32>
    %c24 = arith.constant 24 : index
    %151 = memref.load %arg3[%c24] : memref<80xf32, #tpu.memory_space<smem>>
    %152 = vector.extract_strided_slice %106 {offsets = [0, 0], sizes = [1, 256], strides = [1, 1]} : vector<4x256xf32> to vector<1x256xf32>
    %153 = vector.broadcast %151 : f32 to vector<1x256xf32>
    %154 = arith.mulf %153, %152 : vector<1x256xf32>
    %c25 = arith.constant 25 : index
    %155 = memref.load %arg3[%c25] : memref<80xf32, #tpu.memory_space<smem>>
    %156 = vector.extract_strided_slice %106 {offsets = [1, 0], sizes = [1, 256], strides = [1, 1]} : vector<4x256xf32> to vector<1x256xf32>
    %157 = vector.broadcast %155 : f32 to vector<1x256xf32>
    %158 = arith.mulf %157, %156 : vector<1x256xf32>
    %159 = arith.addf %154, %158 : vector<1x256xf32>
    %c26 = arith.constant 26 : index
    %160 = memref.load %arg3[%c26] : memref<80xf32, #tpu.memory_space<smem>>
    %161 = vector.extract_strided_slice %106 {offsets = [2, 0], sizes = [1, 256], strides = [1, 1]} : vector<4x256xf32> to vector<1x256xf32>
    %162 = vector.broadcast %160 : f32 to vector<1x256xf32>
    %163 = arith.mulf %162, %161 : vector<1x256xf32>
    %164 = arith.addf %159, %163 : vector<1x256xf32>
    %c27 = arith.constant 27 : index
    %165 = memref.load %arg3[%c27] : memref<80xf32, #tpu.memory_space<smem>>
    %166 = vector.extract_strided_slice %106 {offsets = [3, 0], sizes = [1, 256], strides = [1, 1]} : vector<4x256xf32> to vector<1x256xf32>
    %167 = vector.broadcast %165 : f32 to vector<1x256xf32>
    %168 = arith.mulf %167, %166 : vector<1x256xf32>
    %169 = arith.addf %164, %168 : vector<1x256xf32>
    %c6_17 = arith.constant 6 : index
    %170 = memref.load %arg4[%c6_17] : memref<20xf32, #tpu.memory_space<smem>>
    %171 = vector.broadcast %170 : f32 to vector<1x256xf32>
    %172 = arith.addf %169, %171 : vector<1x256xf32>
    %c28 = arith.constant 28 : index
    %173 = memref.load %arg3[%c28] : memref<80xf32, #tpu.memory_space<smem>>
    %174 = vector.extract_strided_slice %106 {offsets = [0, 0], sizes = [1, 256], strides = [1, 1]} : vector<4x256xf32> to vector<1x256xf32>
    %175 = vector.broadcast %173 : f32 to vector<1x256xf32>
    %176 = arith.mulf %175, %174 : vector<1x256xf32>
    %c29 = arith.constant 29 : index
    %177 = memref.load %arg3[%c29] : memref<80xf32, #tpu.memory_space<smem>>
    %178 = vector.extract_strided_slice %106 {offsets = [1, 0], sizes = [1, 256], strides = [1, 1]} : vector<4x256xf32> to vector<1x256xf32>
    %179 = vector.broadcast %177 : f32 to vector<1x256xf32>
    %180 = arith.mulf %179, %178 : vector<1x256xf32>
    %181 = arith.addf %176, %180 : vector<1x256xf32>
    %c30 = arith.constant 30 : index
    %182 = memref.load %arg3[%c30] : memref<80xf32, #tpu.memory_space<smem>>
    %183 = vector.extract_strided_slice %106 {offsets = [2, 0], sizes = [1, 256], strides = [1, 1]} : vector<4x256xf32> to vector<1x256xf32>
    %184 = vector.broadcast %182 : f32 to vector<1x256xf32>
    %185 = arith.mulf %184, %183 : vector<1x256xf32>
    %186 = arith.addf %181, %185 : vector<1x256xf32>
    %c31 = arith.constant 31 : index
    %187 = memref.load %arg3[%c31] : memref<80xf32, #tpu.memory_space<smem>>
    %188 = vector.extract_strided_slice %106 {offsets = [3, 0], sizes = [1, 256], strides = [1, 1]} : vector<4x256xf32> to vector<1x256xf32>
    %189 = vector.broadcast %187 : f32 to vector<1x256xf32>
    %190 = arith.mulf %189, %188 : vector<1x256xf32>
    %191 = arith.addf %186, %190 : vector<1x256xf32>
    %c7_18 = arith.constant 7 : index
    %192 = memref.load %arg4[%c7_18] : memref<20xf32, #tpu.memory_space<smem>>
    %193 = vector.broadcast %192 : f32 to vector<1x256xf32>
    %194 = arith.addf %191, %193 : vector<1x256xf32>
    %195 = tpu.concatenate %128, %150, %172, %194 in 0 : vector<1x256xf32>, vector<1x256xf32>, vector<1x256xf32>, vector<1x256xf32> -> vector<4x256xf32>
    %196 = math.tanh %195 : vector<4x256xf32>
    %c1_19 = arith.constant 1 : index
    %c0_20 = arith.constant 0 : index
    %c0_21 = arith.constant 0 : index
    %197 = vector.load %arg5[%c1_19, %c0_20, %c0_21] : memref<5x4x256xf32, #tpu.memory_space<vmem>>, vector<1x4x256xf32>
    %198 = vector.shape_cast %197 : vector<1x4x256xf32> to vector<4x256xf32>
    %199 = vector.shape_cast %196 : vector<4x256xf32> to vector<1x4x256xf32>
    tpu.vector_store %arg5[%c1_19, %c0_20, %c0_21], %199 {strides = array<i32>} : memref<5x4x256xf32, #tpu.memory_space<vmem>>, vector<1x4x256xf32>,
    %c3_22 = arith.constant 3 : index
    %200 = memref.load %arg2[%c3_22] : memref<12xf32, #tpu.memory_space<smem>>
    %c4_23 = arith.constant 4 : index
    %201 = memref.load %arg2[%c4_23] : memref<12xf32, #tpu.memory_space<smem>>
    %c5_24 = arith.constant 5 : index
    %202 = memref.load %arg2[%c5_24] : memref<12xf32, #tpu.memory_space<smem>>
    %203 = vector.broadcast %200 : f32 to vector<4x256xf32>
    %204 = arith.mulf %203, %106 : vector<4x256xf32>
    %205 = vector.broadcast %201 : f32 to vector<4x256xf32>
    %206 = arith.mulf %205, %196 : vector<4x256xf32>
    %207 = arith.addf %204, %206 : vector<4x256xf32>
    %c1_25 = arith.constant 1 : index
    %c0_26 = arith.constant 0 : index
    %c0_27 = arith.constant 0 : index
    %208 = vector.load %arg1[%c1_25, %c0_26, %c0_27] : memref<4x4x256xf32, #tpu.memory_space<vmem>>, vector<1x4x256xf32>
    %209 = vector.shape_cast %208 : vector<1x4x256xf32> to vector<4x256xf32>
    %210 = vector.broadcast %202 : f32 to vector<4x256xf32>
    %211 = arith.mulf %210, %209 : vector<4x256xf32>
    %212 = arith.addf %207, %211 : vector<4x256xf32>
    %c32 = arith.constant 32 : index
    %213 = memref.load %arg3[%c32] : memref<80xf32, #tpu.memory_space<smem>>
    %214 = vector.extract_strided_slice %212 {offsets = [0, 0], sizes = [1, 256], strides = [1, 1]} : vector<4x256xf32> to vector<1x256xf32>
    %215 = vector.broadcast %213 : f32 to vector<1x256xf32>
    %216 = arith.mulf %215, %214 : vector<1x256xf32>
    %c33 = arith.constant 33 : index
    %217 = memref.load %arg3[%c33] : memref<80xf32, #tpu.memory_space<smem>>
    %218 = vector.extract_strided_slice %212 {offsets = [1, 0], sizes = [1, 256], strides = [1, 1]} : vector<4x256xf32> to vector<1x256xf32>
    %219 = vector.broadcast %217 : f32 to vector<1x256xf32>
    %220 = arith.mulf %219, %218 : vector<1x256xf32>
    %221 = arith.addf %216, %220 : vector<1x256xf32>
    %c34 = arith.constant 34 : index
    %222 = memref.load %arg3[%c34] : memref<80xf32, #tpu.memory_space<smem>>
    %223 = vector.extract_strided_slice %212 {offsets = [2, 0], sizes = [1, 256], strides = [1, 1]} : vector<4x256xf32> to vector<1x256xf32>
    %224 = vector.broadcast %222 : f32 to vector<1x256xf32>
    %225 = arith.mulf %224, %223 : vector<1x256xf32>
    %226 = arith.addf %221, %225 : vector<1x256xf32>
    %c35 = arith.constant 35 : index
    %227 = memref.load %arg3[%c35] : memref<80xf32, #tpu.memory_space<smem>>
    %228 = vector.extract_strided_slice %212 {offsets = [3, 0], sizes = [1, 256], strides = [1, 1]} : vector<4x256xf32> to vector<1x256xf32>
    %229 = vector.broadcast %227 : f32 to vector<1x256xf32>
    %230 = arith.mulf %229, %228 : vector<1x256xf32>
    %231 = arith.addf %226, %230 : vector<1x256xf32>
    %c8_28 = arith.constant 8 : index
    %232 = memref.load %arg4[%c8_28] : memref<20xf32, #tpu.memory_space<smem>>
    %233 = vector.broadcast %232 : f32 to vector<1x256xf32>
    %234 = arith.addf %231, %233 : vector<1x256xf32>
    %c36 = arith.constant 36 : index
    %235 = memref.load %arg3[%c36] : memref<80xf32, #tpu.memory_space<smem>>
    %236 = vector.extract_strided_slice %212 {offsets = [0, 0], sizes = [1, 256], strides = [1, 1]} : vector<4x256xf32> to vector<1x256xf32>
    %237 = vector.broadcast %235 : f32 to vector<1x256xf32>
    %238 = arith.mulf %237, %236 : vector<1x256xf32>
    %c37 = arith.constant 37 : index
    %239 = memref.load %arg3[%c37] : memref<80xf32, #tpu.memory_space<smem>>
    %240 = vector.extract_strided_slice %212 {offsets = [1, 0], sizes = [1, 256], strides = [1, 1]} : vector<4x256xf32> to vector<1x256xf32>
    %241 = vector.broadcast %239 : f32 to vector<1x256xf32>
    %242 = arith.mulf %241, %240 : vector<1x256xf32>
    %243 = arith.addf %238, %242 : vector<1x256xf32>
    %c38 = arith.constant 38 : index
    %244 = memref.load %arg3[%c38] : memref<80xf32, #tpu.memory_space<smem>>
    %245 = vector.extract_strided_slice %212 {offsets = [2, 0], sizes = [1, 256], strides = [1, 1]} : vector<4x256xf32> to vector<1x256xf32>
    %246 = vector.broadcast %244 : f32 to vector<1x256xf32>
    %247 = arith.mulf %246, %245 : vector<1x256xf32>
    %248 = arith.addf %243, %247 : vector<1x256xf32>
    %c39 = arith.constant 39 : index
    %249 = memref.load %arg3[%c39] : memref<80xf32, #tpu.memory_space<smem>>
    %250 = vector.extract_strided_slice %212 {offsets = [3, 0], sizes = [1, 256], strides = [1, 1]} : vector<4x256xf32> to vector<1x256xf32>
    %251 = vector.broadcast %249 : f32 to vector<1x256xf32>
    %252 = arith.mulf %251, %250 : vector<1x256xf32>
    %253 = arith.addf %248, %252 : vector<1x256xf32>
    %c9_29 = arith.constant 9 : index
    %254 = memref.load %arg4[%c9_29] : memref<20xf32, #tpu.memory_space<smem>>
    %255 = vector.broadcast %254 : f32 to vector<1x256xf32>
    %256 = arith.addf %253, %255 : vector<1x256xf32>
    %c40 = arith.constant 40 : index
    %257 = memref.load %arg3[%c40] : memref<80xf32, #tpu.memory_space<smem>>
    %258 = vector.extract_strided_slice %212 {offsets = [0, 0], sizes = [1, 256], strides = [1, 1]} : vector<4x256xf32> to vector<1x256xf32>
    %259 = vector.broadcast %257 : f32 to vector<1x256xf32>
    %260 = arith.mulf %259, %258 : vector<1x256xf32>
    %c41 = arith.constant 41 : index
    %261 = memref.load %arg3[%c41] : memref<80xf32, #tpu.memory_space<smem>>
    %262 = vector.extract_strided_slice %212 {offsets = [1, 0], sizes = [1, 256], strides = [1, 1]} : vector<4x256xf32> to vector<1x256xf32>
    %263 = vector.broadcast %261 : f32 to vector<1x256xf32>
    %264 = arith.mulf %263, %262 : vector<1x256xf32>
    %265 = arith.addf %260, %264 : vector<1x256xf32>
    %c42 = arith.constant 42 : index
    %266 = memref.load %arg3[%c42] : memref<80xf32, #tpu.memory_space<smem>>
    %267 = vector.extract_strided_slice %212 {offsets = [2, 0], sizes = [1, 256], strides = [1, 1]} : vector<4x256xf32> to vector<1x256xf32>
    %268 = vector.broadcast %266 : f32 to vector<1x256xf32>
    %269 = arith.mulf %268, %267 : vector<1x256xf32>
    %270 = arith.addf %265, %269 : vector<1x256xf32>
    %c43 = arith.constant 43 : index
    %271 = memref.load %arg3[%c43] : memref<80xf32, #tpu.memory_space<smem>>
    %272 = vector.extract_strided_slice %212 {offsets = [3, 0], sizes = [1, 256], strides = [1, 1]} : vector<4x256xf32> to vector<1x256xf32>
    %273 = vector.broadcast %271 : f32 to vector<1x256xf32>
    %274 = arith.mulf %273, %272 : vector<1x256xf32>
    %275 = arith.addf %270, %274 : vector<1x256xf32>
    %c10_30 = arith.constant 10 : index
    %276 = memref.load %arg4[%c10_30] : memref<20xf32, #tpu.memory_space<smem>>
    %277 = vector.broadcast %276 : f32 to vector<1x256xf32>
    %278 = arith.addf %275, %277 : vector<1x256xf32>
    %c44 = arith.constant 44 : index
    %279 = memref.load %arg3[%c44] : memref<80xf32, #tpu.memory_space<smem>>
    %280 = vector.extract_strided_slice %212 {offsets = [0, 0], sizes = [1, 256], strides = [1, 1]} : vector<4x256xf32> to vector<1x256xf32>
    %281 = vector.broadcast %279 : f32 to vector<1x256xf32>
    %282 = arith.mulf %281, %280 : vector<1x256xf32>
    %c45 = arith.constant 45 : index
    %283 = memref.load %arg3[%c45] : memref<80xf32, #tpu.memory_space<smem>>
    %284 = vector.extract_strided_slice %212 {offsets = [1, 0], sizes = [1, 256], strides = [1, 1]} : vector<4x256xf32> to vector<1x256xf32>
    %285 = vector.broadcast %283 : f32 to vector<1x256xf32>
    %286 = arith.mulf %285, %284 : vector<1x256xf32>
    %287 = arith.addf %282, %286 : vector<1x256xf32>
    %c46 = arith.constant 46 : index
    %288 = memref.load %arg3[%c46] : memref<80xf32, #tpu.memory_space<smem>>
    %289 = vector.extract_strided_slice %212 {offsets = [2, 0], sizes = [1, 256], strides = [1, 1]} : vector<4x256xf32> to vector<1x256xf32>
    %290 = vector.broadcast %288 : f32 to vector<1x256xf32>
    %291 = arith.mulf %290, %289 : vector<1x256xf32>
    %292 = arith.addf %287, %291 : vector<1x256xf32>
    %c47 = arith.constant 47 : index
    %293 = memref.load %arg3[%c47] : memref<80xf32, #tpu.memory_space<smem>>
    %294 = vector.extract_strided_slice %212 {offsets = [3, 0], sizes = [1, 256], strides = [1, 1]} : vector<4x256xf32> to vector<1x256xf32>
    %295 = vector.broadcast %293 : f32 to vector<1x256xf32>
    %296 = arith.mulf %295, %294 : vector<1x256xf32>
    %297 = arith.addf %292, %296 : vector<1x256xf32>
    %c11_31 = arith.constant 11 : index
    %298 = memref.load %arg4[%c11_31] : memref<20xf32, #tpu.memory_space<smem>>
    %299 = vector.broadcast %298 : f32 to vector<1x256xf32>
    %300 = arith.addf %297, %299 : vector<1x256xf32>
    %301 = tpu.concatenate %234, %256, %278, %300 in 0 : vector<1x256xf32>, vector<1x256xf32>, vector<1x256xf32>, vector<1x256xf32> -> vector<4x256xf32>
    %302 = math.tanh %301 : vector<4x256xf32>
    %c2_32 = arith.constant 2 : index
    %c0_33 = arith.constant 0 : index
    %c0_34 = arith.constant 0 : index
    %303 = vector.load %arg5[%c2_32, %c0_33, %c0_34] : memref<5x4x256xf32, #tpu.memory_space<vmem>>, vector<1x4x256xf32>
    %304 = vector.shape_cast %303 : vector<1x4x256xf32> to vector<4x256xf32>
    %305 = vector.shape_cast %302 : vector<4x256xf32> to vector<1x4x256xf32>
    tpu.vector_store %arg5[%c2_32, %c0_33, %c0_34], %305 {strides = array<i32>} : memref<5x4x256xf32, #tpu.memory_space<vmem>>, vector<1x4x256xf32>,
    %c6_35 = arith.constant 6 : index
    %306 = memref.load %arg2[%c6_35] : memref<12xf32, #tpu.memory_space<smem>>
    %c7_36 = arith.constant 7 : index
    %307 = memref.load %arg2[%c7_36] : memref<12xf32, #tpu.memory_space<smem>>
    %c8_37 = arith.constant 8 : index
    %308 = memref.load %arg2[%c8_37] : memref<12xf32, #tpu.memory_space<smem>>
    %309 = vector.broadcast %306 : f32 to vector<4x256xf32>
    %310 = arith.mulf %309, %212 : vector<4x256xf32>
    %311 = vector.broadcast %307 : f32 to vector<4x256xf32>
    %312 = arith.mulf %311, %302 : vector<4x256xf32>
    %313 = arith.addf %310, %312 : vector<4x256xf32>
    %c2_38 = arith.constant 2 : index
    %c0_39 = arith.constant 0 : index
    %c0_40 = arith.constant 0 : index
    %314 = vector.load %arg1[%c2_38, %c0_39, %c0_40] : memref<4x4x256xf32, #tpu.memory_space<vmem>>, vector<1x4x256xf32>
    %315 = vector.shape_cast %314 : vector<1x4x256xf32> to vector<4x256xf32>
    %316 = vector.broadcast %308 : f32 to vector<4x256xf32>
    %317 = arith.mulf %316, %315 : vector<4x256xf32>
    %318 = arith.addf %313, %317 : vector<4x256xf32>
    %c48 = arith.constant 48 : index
    %319 = memref.load %arg3[%c48] : memref<80xf32, #tpu.memory_space<smem>>
    %320 = vector.extract_strided_slice %318 {offsets = [0, 0], sizes = [1, 256], strides = [1, 1]} : vector<4x256xf32> to vector<1x256xf32>
    %321 = vector.broadcast %319 : f32 to vector<1x256xf32>
    %322 = arith.mulf %321, %320 : vector<1x256xf32>
    %c49 = arith.constant 49 : index
    %323 = memref.load %arg3[%c49] : memref<80xf32, #tpu.memory_space<smem>>
    %324 = vector.extract_strided_slice %318 {offsets = [1, 0], sizes = [1, 256], strides = [1, 1]} : vector<4x256xf32> to vector<1x256xf32>
    %325 = vector.broadcast %323 : f32 to vector<1x256xf32>
    %326 = arith.mulf %325, %324 : vector<1x256xf32>
    %327 = arith.addf %322, %326 : vector<1x256xf32>
    %c50 = arith.constant 50 : index
    %328 = memref.load %arg3[%c50] : memref<80xf32, #tpu.memory_space<smem>>
    %329 = vector.extract_strided_slice %318 {offsets = [2, 0], sizes = [1, 256], strides = [1, 1]} : vector<4x256xf32> to vector<1x256xf32>
    %330 = vector.broadcast %328 : f32 to vector<1x256xf32>
    %331 = arith.mulf %330, %329 : vector<1x256xf32>
    %332 = arith.addf %327, %331 : vector<1x256xf32>
    %c51 = arith.constant 51 : index
    %333 = memref.load %arg3[%c51] : memref<80xf32, #tpu.memory_space<smem>>
    %334 = vector.extract_strided_slice %318 {offsets = [3, 0], sizes = [1, 256], strides = [1, 1]} : vector<4x256xf32> to vector<1x256xf32>
    %335 = vector.broadcast %333 : f32 to vector<1x256xf32>
    %336 = arith.mulf %335, %334 : vector<1x256xf32>
    %337 = arith.addf %332, %336 : vector<1x256xf32>
    %c12_41 = arith.constant 12 : index
    %338 = memref.load %arg4[%c12_41] : memref<20xf32, #tpu.memory_space<smem>>
    %339 = vector.broadcast %338 : f32 to vector<1x256xf32>
    %340 = arith.addf %337, %339 : vector<1x256xf32>
    %c52 = arith.constant 52 : index
    %341 = memref.load %arg3[%c52] : memref<80xf32, #tpu.memory_space<smem>>
    %342 = vector.extract_strided_slice %318 {offsets = [0, 0], sizes = [1, 256], strides = [1, 1]} : vector<4x256xf32> to vector<1x256xf32>
    %343 = vector.broadcast %341 : f32 to vector<1x256xf32>
    %344 = arith.mulf %343, %342 : vector<1x256xf32>
    %c53 = arith.constant 53 : index
    %345 = memref.load %arg3[%c53] : memref<80xf32, #tpu.memory_space<smem>>
    %346 = vector.extract_strided_slice %318 {offsets = [1, 0], sizes = [1, 256], strides = [1, 1]} : vector<4x256xf32> to vector<1x256xf32>
    %347 = vector.broadcast %345 : f32 to vector<1x256xf32>
    %348 = arith.mulf %347, %346 : vector<1x256xf32>
    %349 = arith.addf %344, %348 : vector<1x256xf32>
    %c54 = arith.constant 54 : index
    %350 = memref.load %arg3[%c54] : memref<80xf32, #tpu.memory_space<smem>>
    %351 = vector.extract_strided_slice %318 {offsets = [2, 0], sizes = [1, 256], strides = [1, 1]} : vector<4x256xf32> to vector<1x256xf32>
    %352 = vector.broadcast %350 : f32 to vector<1x256xf32>
    %353 = arith.mulf %352, %351 : vector<1x256xf32>
    %354 = arith.addf %349, %353 : vector<1x256xf32>
    %c55 = arith.constant 55 : index
    %355 = memref.load %arg3[%c55] : memref<80xf32, #tpu.memory_space<smem>>
    %356 = vector.extract_strided_slice %318 {offsets = [3, 0], sizes = [1, 256], strides = [1, 1]} : vector<4x256xf32> to vector<1x256xf32>
    %357 = vector.broadcast %355 : f32 to vector<1x256xf32>
    %358 = arith.mulf %357, %356 : vector<1x256xf32>
    %359 = arith.addf %354, %358 : vector<1x256xf32>
    %c13_42 = arith.constant 13 : index
    %360 = memref.load %arg4[%c13_42] : memref<20xf32, #tpu.memory_space<smem>>
    %361 = vector.broadcast %360 : f32 to vector<1x256xf32>
    %362 = arith.addf %359, %361 : vector<1x256xf32>
    %c56 = arith.constant 56 : index
    %363 = memref.load %arg3[%c56] : memref<80xf32, #tpu.memory_space<smem>>
    %364 = vector.extract_strided_slice %318 {offsets = [0, 0], sizes = [1, 256], strides = [1, 1]} : vector<4x256xf32> to vector<1x256xf32>
    %365 = vector.broadcast %363 : f32 to vector<1x256xf32>
    %366 = arith.mulf %365, %364 : vector<1x256xf32>
    %c57 = arith.constant 57 : index
    %367 = memref.load %arg3[%c57] : memref<80xf32, #tpu.memory_space<smem>>
    %368 = vector.extract_strided_slice %318 {offsets = [1, 0], sizes = [1, 256], strides = [1, 1]} : vector<4x256xf32> to vector<1x256xf32>
    %369 = vector.broadcast %367 : f32 to vector<1x256xf32>
    %370 = arith.mulf %369, %368 : vector<1x256xf32>
    %371 = arith.addf %366, %370 : vector<1x256xf32>
    %c58 = arith.constant 58 : index
    %372 = memref.load %arg3[%c58] : memref<80xf32, #tpu.memory_space<smem>>
    %373 = vector.extract_strided_slice %318 {offsets = [2, 0], sizes = [1, 256], strides = [1, 1]} : vector<4x256xf32> to vector<1x256xf32>
    %374 = vector.broadcast %372 : f32 to vector<1x256xf32>
    %375 = arith.mulf %374, %373 : vector<1x256xf32>
    %376 = arith.addf %371, %375 : vector<1x256xf32>
    %c59 = arith.constant 59 : index
    %377 = memref.load %arg3[%c59] : memref<80xf32, #tpu.memory_space<smem>>
    %378 = vector.extract_strided_slice %318 {offsets = [3, 0], sizes = [1, 256], strides = [1, 1]} : vector<4x256xf32> to vector<1x256xf32>
    %379 = vector.broadcast %377 : f32 to vector<1x256xf32>
    %380 = arith.mulf %379, %378 : vector<1x256xf32>
    %381 = arith.addf %376, %380 : vector<1x256xf32>
    %c14_43 = arith.constant 14 : index
    %382 = memref.load %arg4[%c14_43] : memref<20xf32, #tpu.memory_space<smem>>
    %383 = vector.broadcast %382 : f32 to vector<1x256xf32>
    %384 = arith.addf %381, %383 : vector<1x256xf32>
    %c60 = arith.constant 60 : index
    %385 = memref.load %arg3[%c60] : memref<80xf32, #tpu.memory_space<smem>>
    %386 = vector.extract_strided_slice %318 {offsets = [0, 0], sizes = [1, 256], strides = [1, 1]} : vector<4x256xf32> to vector<1x256xf32>
    %387 = vector.broadcast %385 : f32 to vector<1x256xf32>
    %388 = arith.mulf %387, %386 : vector<1x256xf32>
    %c61 = arith.constant 61 : index
    %389 = memref.load %arg3[%c61] : memref<80xf32, #tpu.memory_space<smem>>
    %390 = vector.extract_strided_slice %318 {offsets = [1, 0], sizes = [1, 256], strides = [1, 1]} : vector<4x256xf32> to vector<1x256xf32>
    %391 = vector.broadcast %389 : f32 to vector<1x256xf32>
    %392 = arith.mulf %391, %390 : vector<1x256xf32>
    %393 = arith.addf %388, %392 : vector<1x256xf32>
    %c62 = arith.constant 62 : index
    %394 = memref.load %arg3[%c62] : memref<80xf32, #tpu.memory_space<smem>>
    %395 = vector.extract_strided_slice %318 {offsets = [2, 0], sizes = [1, 256], strides = [1, 1]} : vector<4x256xf32> to vector<1x256xf32>
    %396 = vector.broadcast %394 : f32 to vector<1x256xf32>
    %397 = arith.mulf %396, %395 : vector<1x256xf32>
    %398 = arith.addf %393, %397 : vector<1x256xf32>
    %c63 = arith.constant 63 : index
    %399 = memref.load %arg3[%c63] : memref<80xf32, #tpu.memory_space<smem>>
    %400 = vector.extract_strided_slice %318 {offsets = [3, 0], sizes = [1, 256], strides = [1, 1]} : vector<4x256xf32> to vector<1x256xf32>
    %401 = vector.broadcast %399 : f32 to vector<1x256xf32>
    %402 = arith.mulf %401, %400 : vector<1x256xf32>
    %403 = arith.addf %398, %402 : vector<1x256xf32>
    %c15_44 = arith.constant 15 : index
    %404 = memref.load %arg4[%c15_44] : memref<20xf32, #tpu.memory_space<smem>>
    %405 = vector.broadcast %404 : f32 to vector<1x256xf32>
    %406 = arith.addf %403, %405 : vector<1x256xf32>
    %407 = tpu.concatenate %340, %362, %384, %406 in 0 : vector<1x256xf32>, vector<1x256xf32>, vector<1x256xf32>, vector<1x256xf32> -> vector<4x256xf32>
    %408 = math.tanh %407 : vector<4x256xf32>
    %c3_45 = arith.constant 3 : index
    %c0_46 = arith.constant 0 : index
    %c0_47 = arith.constant 0 : index
    %409 = vector.load %arg5[%c3_45, %c0_46, %c0_47] : memref<5x4x256xf32, #tpu.memory_space<vmem>>, vector<1x4x256xf32>
    %410 = vector.shape_cast %409 : vector<1x4x256xf32> to vector<4x256xf32>
    %411 = vector.shape_cast %408 : vector<4x256xf32> to vector<1x4x256xf32>
    tpu.vector_store %arg5[%c3_45, %c0_46, %c0_47], %411 {strides = array<i32>} : memref<5x4x256xf32, #tpu.memory_space<vmem>>, vector<1x4x256xf32>,
    %c9_48 = arith.constant 9 : index
    %412 = memref.load %arg2[%c9_48] : memref<12xf32, #tpu.memory_space<smem>>
    %c10_49 = arith.constant 10 : index
    %413 = memref.load %arg2[%c10_49] : memref<12xf32, #tpu.memory_space<smem>>
    %c11_50 = arith.constant 11 : index
    %414 = memref.load %arg2[%c11_50] : memref<12xf32, #tpu.memory_space<smem>>
    %415 = vector.broadcast %412 : f32 to vector<4x256xf32>
    %416 = arith.mulf %415, %318 : vector<4x256xf32>
    %417 = vector.broadcast %413 : f32 to vector<4x256xf32>
    %418 = arith.mulf %417, %408 : vector<4x256xf32>
    %419 = arith.addf %416, %418 : vector<4x256xf32>
    %c3_51 = arith.constant 3 : index
    %c0_52 = arith.constant 0 : index
    %c0_53 = arith.constant 0 : index
    %420 = vector.load %arg1[%c3_51, %c0_52, %c0_53] : memref<4x4x256xf32, #tpu.memory_space<vmem>>, vector<1x4x256xf32>
    %421 = vector.shape_cast %420 : vector<1x4x256xf32> to vector<4x256xf32>
    %422 = vector.broadcast %414 : f32 to vector<4x256xf32>
    %423 = arith.mulf %422, %421 : vector<4x256xf32>
    %424 = arith.addf %419, %423 : vector<4x256xf32>
    %c64 = arith.constant 64 : index
    %425 = memref.load %arg3[%c64] : memref<80xf32, #tpu.memory_space<smem>>
    %426 = vector.extract_strided_slice %424 {offsets = [0, 0], sizes = [1, 256], strides = [1, 1]} : vector<4x256xf32> to vector<1x256xf32>
    %427 = vector.broadcast %425 : f32 to vector<1x256xf32>
    %428 = arith.mulf %427, %426 : vector<1x256xf32>
    %c65 = arith.constant 65 : index
    %429 = memref.load %arg3[%c65] : memref<80xf32, #tpu.memory_space<smem>>
    %430 = vector.extract_strided_slice %424 {offsets = [1, 0], sizes = [1, 256], strides = [1, 1]} : vector<4x256xf32> to vector<1x256xf32>
    %431 = vector.broadcast %429 : f32 to vector<1x256xf32>
    %432 = arith.mulf %431, %430 : vector<1x256xf32>
    %433 = arith.addf %428, %432 : vector<1x256xf32>
    %c66 = arith.constant 66 : index
    %434 = memref.load %arg3[%c66] : memref<80xf32, #tpu.memory_space<smem>>
    %435 = vector.extract_strided_slice %424 {offsets = [2, 0], sizes = [1, 256], strides = [1, 1]} : vector<4x256xf32> to vector<1x256xf32>
    %436 = vector.broadcast %434 : f32 to vector<1x256xf32>
    %437 = arith.mulf %436, %435 : vector<1x256xf32>
    %438 = arith.addf %433, %437 : vector<1x256xf32>
    %c67 = arith.constant 67 : index
    %439 = memref.load %arg3[%c67] : memref<80xf32, #tpu.memory_space<smem>>
    %440 = vector.extract_strided_slice %424 {offsets = [3, 0], sizes = [1, 256], strides = [1, 1]} : vector<4x256xf32> to vector<1x256xf32>
    %441 = vector.broadcast %439 : f32 to vector<1x256xf32>
    %442 = arith.mulf %441, %440 : vector<1x256xf32>
    %443 = arith.addf %438, %442 : vector<1x256xf32>
    %c16_54 = arith.constant 16 : index
    %444 = memref.load %arg4[%c16_54] : memref<20xf32, #tpu.memory_space<smem>>
    %445 = vector.broadcast %444 : f32 to vector<1x256xf32>
    %446 = arith.addf %443, %445 : vector<1x256xf32>
    %c68 = arith.constant 68 : index
    %447 = memref.load %arg3[%c68] : memref<80xf32, #tpu.memory_space<smem>>
    %448 = vector.extract_strided_slice %424 {offsets = [0, 0], sizes = [1, 256], strides = [1, 1]} : vector<4x256xf32> to vector<1x256xf32>
    %449 = vector.broadcast %447 : f32 to vector<1x256xf32>
    %450 = arith.mulf %449, %448 : vector<1x256xf32>
    %c69 = arith.constant 69 : index
    %451 = memref.load %arg3[%c69] : memref<80xf32, #tpu.memory_space<smem>>
    %452 = vector.extract_strided_slice %424 {offsets = [1, 0], sizes = [1, 256], strides = [1, 1]} : vector<4x256xf32> to vector<1x256xf32>
    %453 = vector.broadcast %451 : f32 to vector<1x256xf32>
    %454 = arith.mulf %453, %452 : vector<1x256xf32>
    %455 = arith.addf %450, %454 : vector<1x256xf32>
    %c70 = arith.constant 70 : index
    %456 = memref.load %arg3[%c70] : memref<80xf32, #tpu.memory_space<smem>>
    %457 = vector.extract_strided_slice %424 {offsets = [2, 0], sizes = [1, 256], strides = [1, 1]} : vector<4x256xf32> to vector<1x256xf32>
    %458 = vector.broadcast %456 : f32 to vector<1x256xf32>
    %459 = arith.mulf %458, %457 : vector<1x256xf32>
    %460 = arith.addf %455, %459 : vector<1x256xf32>
    %c71 = arith.constant 71 : index
    %461 = memref.load %arg3[%c71] : memref<80xf32, #tpu.memory_space<smem>>
    %462 = vector.extract_strided_slice %424 {offsets = [3, 0], sizes = [1, 256], strides = [1, 1]} : vector<4x256xf32> to vector<1x256xf32>
    %463 = vector.broadcast %461 : f32 to vector<1x256xf32>
    %464 = arith.mulf %463, %462 : vector<1x256xf32>
    %465 = arith.addf %460, %464 : vector<1x256xf32>
    %c17_55 = arith.constant 17 : index
    %466 = memref.load %arg4[%c17_55] : memref<20xf32, #tpu.memory_space<smem>>
    %467 = vector.broadcast %466 : f32 to vector<1x256xf32>
    %468 = arith.addf %465, %467 : vector<1x256xf32>
    %c72 = arith.constant 72 : index
    %469 = memref.load %arg3[%c72] : memref<80xf32, #tpu.memory_space<smem>>
    %470 = vector.extract_strided_slice %424 {offsets = [0, 0], sizes = [1, 256], strides = [1, 1]} : vector<4x256xf32> to vector<1x256xf32>
    %471 = vector.broadcast %469 : f32 to vector<1x256xf32>
    %472 = arith.mulf %471, %470 : vector<1x256xf32>
    %c73 = arith.constant 73 : index
    %473 = memref.load %arg3[%c73] : memref<80xf32, #tpu.memory_space<smem>>
    %474 = vector.extract_strided_slice %424 {offsets = [1, 0], sizes = [1, 256], strides = [1, 1]} : vector<4x256xf32> to vector<1x256xf32>
    %475 = vector.broadcast %473 : f32 to vector<1x256xf32>
    %476 = arith.mulf %475, %474 : vector<1x256xf32>
    %477 = arith.addf %472, %476 : vector<1x256xf32>
    %c74 = arith.constant 74 : index
    %478 = memref.load %arg3[%c74] : memref<80xf32, #tpu.memory_space<smem>>
    %479 = vector.extract_strided_slice %424 {offsets = [2, 0], sizes = [1, 256], strides = [1, 1]} : vector<4x256xf32> to vector<1x256xf32>
    %480 = vector.broadcast %478 : f32 to vector<1x256xf32>
    %481 = arith.mulf %480, %479 : vector<1x256xf32>
    %482 = arith.addf %477, %481 : vector<1x256xf32>
    %c75 = arith.constant 75 : index
    %483 = memref.load %arg3[%c75] : memref<80xf32, #tpu.memory_space<smem>>
    %484 = vector.extract_strided_slice %424 {offsets = [3, 0], sizes = [1, 256], strides = [1, 1]} : vector<4x256xf32> to vector<1x256xf32>
    %485 = vector.broadcast %483 : f32 to vector<1x256xf32>
    %486 = arith.mulf %485, %484 : vector<1x256xf32>
    %487 = arith.addf %482, %486 : vector<1x256xf32>
    %c18_56 = arith.constant 18 : index
    %488 = memref.load %arg4[%c18_56] : memref<20xf32, #tpu.memory_space<smem>>
    %489 = vector.broadcast %488 : f32 to vector<1x256xf32>
    %490 = arith.addf %487, %489 : vector<1x256xf32>
    %c76 = arith.constant 76 : index
    %491 = memref.load %arg3[%c76] : memref<80xf32, #tpu.memory_space<smem>>
    %492 = vector.extract_strided_slice %424 {offsets = [0, 0], sizes = [1, 256], strides = [1, 1]} : vector<4x256xf32> to vector<1x256xf32>
    %493 = vector.broadcast %491 : f32 to vector<1x256xf32>
    %494 = arith.mulf %493, %492 : vector<1x256xf32>
    %c77 = arith.constant 77 : index
    %495 = memref.load %arg3[%c77] : memref<80xf32, #tpu.memory_space<smem>>
    %496 = vector.extract_strided_slice %424 {offsets = [1, 0], sizes = [1, 256], strides = [1, 1]} : vector<4x256xf32> to vector<1x256xf32>
    %497 = vector.broadcast %495 : f32 to vector<1x256xf32>
    %498 = arith.mulf %497, %496 : vector<1x256xf32>
    %499 = arith.addf %494, %498 : vector<1x256xf32>
    %c78 = arith.constant 78 : index
    %500 = memref.load %arg3[%c78] : memref<80xf32, #tpu.memory_space<smem>>
    %501 = vector.extract_strided_slice %424 {offsets = [2, 0], sizes = [1, 256], strides = [1, 1]} : vector<4x256xf32> to vector<1x256xf32>
    %502 = vector.broadcast %500 : f32 to vector<1x256xf32>
    %503 = arith.mulf %502, %501 : vector<1x256xf32>
    %504 = arith.addf %499, %503 : vector<1x256xf32>
    %c79 = arith.constant 79 : index
    %505 = memref.load %arg3[%c79] : memref<80xf32, #tpu.memory_space<smem>>
    %506 = vector.extract_strided_slice %424 {offsets = [3, 0], sizes = [1, 256], strides = [1, 1]} : vector<4x256xf32> to vector<1x256xf32>
    %507 = vector.broadcast %505 : f32 to vector<1x256xf32>
    %508 = arith.mulf %507, %506 : vector<1x256xf32>
    %509 = arith.addf %504, %508 : vector<1x256xf32>
    %c19_57 = arith.constant 19 : index
    %510 = memref.load %arg4[%c19_57] : memref<20xf32, #tpu.memory_space<smem>>
    %511 = vector.broadcast %510 : f32 to vector<1x256xf32>
    %512 = arith.addf %509, %511 : vector<1x256xf32>
    %513 = tpu.concatenate %446, %468, %490, %512 in 0 : vector<1x256xf32>, vector<1x256xf32>, vector<1x256xf32>, vector<1x256xf32> -> vector<4x256xf32>
    %514 = math.tanh %513 : vector<4x256xf32>
    %c4_58 = arith.constant 4 : index
    %c0_59 = arith.constant 0 : index
    %c0_60 = arith.constant 0 : index
    %515 = vector.load %arg5[%c4_58, %c0_59, %c0_60] : memref<5x4x256xf32, #tpu.memory_space<vmem>>, vector<1x4x256xf32>
    %516 = vector.shape_cast %515 : vector<1x4x256xf32> to vector<4x256xf32>
    %517 = vector.shape_cast %514 : vector<4x256xf32> to vector<1x4x256xf32>
    tpu.vector_store %arg5[%c4_58, %c0_59, %c0_60], %517 {strides = array<i32>} : memref<5x4x256xf32, #tpu.memory_space<vmem>>, vector<1x4x256xf32>,
    return
  }
}

</mosaic_0001>

<bundles_post_ra>
// kernel: sb_forward.3
= control target key start
LH: loop header
LB: loop body
LE: loop exit
PB: predicated region body
PF: predicated region fallthrough
CT: control target
= control target key end

     0   :  { %10 = vsyncpa [#allocation3], 0  ;;  %s1763_s0 = inlined_call_operand.vmem [shape: f32[4,256], index: 0, kind: input, shape index: {}]   ;;  %s1764_s1 = inlined_call_operand.vmem [shape: f32[4,4,256], index: 1, kind: input, shape index: {}]   ;;  %s1765_s2 = inlined_call_operand.vmem [shape: f32[12], index: 2, kind: input, shape index: {}]   ;;  %s1766_s3 = inlined_call_operand.vmem [shape: f32[80], index: 3, kind: input, shape index: {}]   ;;  %s1767_s4 = inlined_call_operand.vmem [shape: f32[20], index: 4, kind: input, shape index: {}]   ;;  %s1768_s5 = inlined_call_operand.vmem [shape: f32[5,4,256], index: 5, kind: output, shape index: {}]  }
   0x1   :  { %11 = vsyncpa [#allocation5], 0  ;;  %s32_s20 = sshll.u32 %s1766_s3, 4  ;;  %s22_s23 = sshll.u32 %s1765_s2, 4  ;;  %s33_s20 = int_to_ptr.vmem [resolvable:$true] %s32_s20  ;;  %s23_s23 = int_to_ptr.vmem [resolvable:$true] %s22_s23 }
   0x2   :  { %s1225_s24 = scalar_lea.vmem %s33_s20, 16  ;;  %p1230_p1 = scmp.lt.s32.totalorder %s33_s20, %s33_s20 }
   0x3   :  { %p1226_p0 = scmp.ne.s32.totalorder %s33_s20, %s1225_s24  ;;  %p1231_p2 = scmp.lt.s32.totalorder %s1225_s24, %s1225_s24 }
   0x5   :  { %p1232_p3 = por %p1231_p2, %p1230_p1 }
   0x7   :  { %p1233_p4 = pnand %p1232_p3, %p1226_p0 }
   0x9   :  { %1236 = shalt.err (!%p1233_p4)
}
   0xa   :  { %s1265_s25 = smov [#allocation4]   ;;  %s1237_s26 = scalar_lea.vmem %s23_s23, 16 }
   0xb   :  { %35 = dma.vmem_to_smem %s33_s20, 16, %s1265_s25, [#allocation5]  }
   0xc   :  { %p1238_p5 = scmp.ne.s32.totalorder %s23_s23, %s1237_s26  ;;  %p1242_p6 = scmp.lt.s32.totalorder %s23_s23, %s23_s23 }
   0xd   :  { %p1243_p7 = scmp.lt.s32.totalorder %s1237_s26, %s1237_s26 }
   0xf   :  { %p1244_p8 = por %p1243_p7, %p1242_p6 }
  0x11   :  { %p1245_p9 = pnand %p1244_p8, %p1238_p5 }
  0x13   :  { %1248 = shalt.err (!%p1245_p9)
}
  0x14   :  { %s1266_s3 = smov [#allocation2]   ;;  %s42_s28 = sshll.u32 %s1767_s4, 4  ;;  %s43_s28 = int_to_ptr.vmem [resolvable:$true] %s42_s28 }
  0x15   :  { %25 = dma.vmem_to_smem %s23_s23, 16, %s1266_s3, [#allocation3]  }
  0x16   :  { %s1249_s29 = scalar_lea.vmem %s43_s28, 16  ;;  %p1254_p11 = scmp.lt.s32.totalorder %s43_s28, %s43_s28 }
  0x17   :  { %p1250_p10 = scmp.ne.s32.totalorder %s43_s28, %s1249_s29  ;;  %p1255_p12 = scmp.lt.s32.totalorder %s1249_s29, %s1249_s29 }
  0x19   :  { %p1256_p13 = por %p1255_p12, %p1254_p11 }
  0x1b   :  { %p1257_p0 = pnand %p1256_p13, %p1250_p10 }
  0x1d   :  { %1260 = shalt.err (!%p1257_p0)
}
  0x1e   :  { %s1267_s30 = smov [#allocation6]  }
  0x1f   :  { %45 = dma.vmem_to_smem %s43_s28, 16, %s1267_s30, [#allocation5]  }
  0x20   :  { %1261 = dma.done.wait [#allocation3], 16  }
  0x21   :  { %1262 = vsyncadd [#allocation3], 4294967280 }
  0x22   :  { %1263 = dma.done.wait [#allocation5], 32  }
  0x23   :  { %1264 = vsyncadd [#allocation5], 4294967264 }
  0x24   :  { %55 = sfence }
  0x25   :  { %s57_s6 = sld [smem:[#allocation4]]  ;;  %s1026_s7 = sld [smem:[#allocation4 + $0x1]]  ;;  %v178_v0 = vlaneseq  ;;  %v1312_v2 = vld [vmem:[%s1763_s0] sm:$0xff]  ;;  %vm221_vm0 = vcmask 1040384   ;;  %vm224_vm1 = vcmask 1041408   ;;  %vm227_vm2 = vcmask 1042432  }
  0x26   :  { %s1028_s8 = sld [smem:[#allocation4 + $0x2]]  ;;  %s1030_s4 = sld [smem:[#allocation4 + $0x3]] }
  0x27   :  { %s1307_s9 = sld [smem:[#allocation6]]  ;;  %s1032_s10 = sld [smem:[#allocation4 + $0x4]]  ;;  %v179_v1 = vshrl.u32 %v178_v0, 7 }
  0x28   :  { %s1033_s11 = sld [smem:[#allocation4 + $0x5]]  ;;  %s1035_s12 = sld [smem:[#allocation4 + $0x6]] }
  0x29   :  { %s1314_s15 = sld [smem:[#allocation4 + $0x7]]  ;;  %s1316_s16 = sld [smem:[#allocation4 + $0x8]]  ;;  %v1324_v5 = vsub.s32 0, %v179_v1  ;;  %v1334_v13 = vsub.s32 4, %v179_v1 }
  0x2a   :  { %s1318_s17 = sld [smem:[#allocation4 + $0x9]]  ;;  %s1320_s18 = sld [smem:[#allocation4 + $0xa]] }
  0x2b   :  { %v58_v3 = vstv %s57_s6  ;;  %v61_v4 = vstv %s1026_s7  ;;  %s1322_s19 = sld [smem:[#allocation4 + $0xb]]  ;;  %s1328_s0 = sld [smem:[#allocation6 + $0x1]] }
  0x2c   :  { %v59_v6 = vmul.f32 %v58_v3, %v1312_v2  ;;  %v62_v7 = vmul.f32 %v61_v4, %v1312_v2  ;;  %v69_v8 = vstv %s1028_s8  ;;  %v77_v9 = vstv %s1030_s4  ;;  %s1330_s20 = sld [smem:[#allocation4 + $0xc]]  ;;  %s1337_s21 = sld [smem:[#allocation4 + $0xd]] }
  0x2d   :  { %v70_v10 = vmul.f32 %v69_v8, %v1312_v2  ;;  %v78_v11 = vmul.f32 %v77_v9, %v1312_v2  ;;  %v88_v12 = vstv %s1032_s10  ;;  %v85_v15 = vstv %s1307_s9  ;;  %s1339_s22 = sld [smem:[#allocation4 + $0xe]]  ;;  %s1346_s23 = sld [smem:[#allocation4 + $0xf]] }
  0x2e   :  { %v1027_v14 = vrot.slane %v62_v7, 9  ;;  %v91_v16 = vstv %s1033_s11  ;;  %v99_v17 = vstv %s1035_s12  ;;  %v89_v19 = vmul.f32 %v88_v12, %v1312_v2  ;;  %s1353_s24 = sld [smem:[#allocation6 + $0x2]]  ;;  %s1055_s25 = sld [smem:[#allocation6 + $0x3]] }
  0x2f   :  { %v1029_v18 = vrot.slane %v70_v10, 10  ;;  %v92_v20 = vmul.f32 %v91_v16, %v1312_v2  ;;  %v100_v21 = vmul.f32 %v99_v17, %v1312_v2  ;;  %v1031_v23 = vrot.slane %v78_v11, 11  ;;  %s1056_s26 = sld [smem:[#allocation2 + $0x1]]  ;;  %s237_s3 = sld [smem:[#allocation2]] }
  0x30   :  { %v67_v22 = vadd.f32 %v1027_v14, %v59_v6  ;;  %v107_v24 = vstv %s1314_s15  ;;  %v118_v25 = vstv %s1316_s16  ;;  %v121_v31 = vstv %s1318_s17  ;;  %s1057_s2 = sld [smem:[#allocation2 + $0x2]]  ;;  %s1382_s27 = sld [smem:[#allocation4 + $0x10]] }
  0x31   :  { %v1034_v26 = vrot.slane %v92_v20, 9  ;;  %v1036_v27 = vrot.slane %v100_v21, 10  ;;  %v108_v28 = vmul.f32 %v107_v24, %v1312_v2  ;;  %v119_v29 = vmul.f32 %v118_v25, %v1312_v2  ;;  %s1384_s28 = sld [smem:[#allocation4 + $0x11]]  ;;  %s1386_s29 = sld [smem:[#allocation4 + $0x12]] }
  0x32   :  { %v75_v30 = vadd.f32 %v1029_v18, %v67_v22  ;;  %v129_v32 = vstv %s1320_s18  ;;  %v137_v33 = vstv %s1322_s19  ;;  %v122_v36 = vmul.f32 %v121_v31, %v1312_v2  ;;  %s1388_s30 = sld [smem:[#allocation4 + $0x13]]  ;;  %s1390_s6 = sld [smem:[#allocation6 + $0x4]] }
  0x33   :  { %v97_v34 = vadd.f32 %v1034_v26, %v89_v19  ;;  %v1038_v35 = vrot.slane %v108_v28, 11  ;;  %v130_v37 = vmul.f32 %v129_v32, %v1312_v2  ;;  %v115_v39 = vstv %s1328_s0  ;;  %s1392_s7 = sld [smem:[#allocation4 + $0x14]]  ;;  %s1394_s8 = sld [smem:[#allocation4 + $0x15]] }
  0x34   :  { %v83_v38 = vadd.f32 %v1031_v23, %v75_v30  ;;  %v138_v40 = vmul.f32 %v137_v33, %v1312_v2  ;;  %v148_v41 = vstv %s1330_s20  ;;  %v1042_v43 = vrot.slane %v122_v36, 9  ;;  %s1396_s4 = sld [smem:[#allocation4 + $0x16]]  ;;  %s1398_s9 = sld [smem:[#allocation4 + $0x17]] }
  0x35   :  { %v105_v42 = vadd.f32 %v1036_v27, %v97_v34  ;;  %v1044_v44 = vrot.slane %v130_v37, 10  ;;  %v149_v45 = vmul.f32 %v148_v41, %v1312_v2  ;;  %v151_v48 = vstv %s1337_s21  ;;  %s1400_s10 = sld [smem:[#allocation4 + $0x18]]  ;;  %s1402_s11 = sld [smem:[#allocation4 + $0x19]]  ;;  %v250_v27 = vld [vmem:[%s1764_s1] sm:$0xff] }
  0x36   :  { %v86_v46 = vadd.f32 %v85_v15, %v83_v38  ;;  %v1046_v47 = vrot.slane %v138_v40, 11  ;;  %v159_v49 = vstv %s1339_s22  ;;  %v127_v51 = vadd.f32 %v1042_v43, %v119_v29  ;;  %s1404_s12 = sld [smem:[#allocation4 + $0x1a]]  ;;  %s1406_s13 = sld [smem:[#allocation4 + $0x1b]] }
  0x37   :  { %v113_v50 = vadd.f32 %v1038_v35, %v105_v42  ;;  %v152_v52 = vmul.f32 %v151_v48, %v1312_v2  ;;  %v160_v53 = vmul.f32 %v159_v49, %v1312_v2  ;;  %v167_v54 = vstv %s1346_s23  ;;  %s1408_s14 = sld [smem:[#allocation4 + $0x1c]]  ;;  %s1410_s15 = sld [smem:[#allocation4 + $0x1d]] }
  0x38   :  { %v135_v56 = vadd.f32 %v1044_v44, %v127_v51  ;;  %v145_v59 = vstv %s1353_s24  ;;  %v168_v60 = vmul.f32 %v167_v54, %v1312_v2  ;;  %v181_v61 = vrot.slane %v86_v46, %v1324_v5  ;;  %s1415_s18 = sld [smem:[#allocation4 + $0x1e]]  ;;  %s1417_s19 = sld [smem:[#allocation4 + $0x1f]] }
  0x39   :  { %v116_v55 = vadd.f32 %v115_v39, %v113_v50  ;;  %v1050_v57 = vrot.slane %v152_v52, 9  ;;  %v1052_v58 = vrot.slane %v160_v53, 10  ;;  %v185_v62 = vrot.slane %v86_v46, %v1334_v13  ;;  %s1446_s21 = sld [smem:[#allocation6 + $0x5]]  ;;  %s1453_s22 = sld [smem:[#allocation6 + $0x6]] }
  0x3a   :  { %v143_v63 = vadd.f32 %v1046_v47, %v135_v56  ;;  %v1054_v4 = vrot.slane %v168_v60, 11  ;;  %v175_v8 = vstv %s1055_s25  ;;  %v242_v22 = vstv %s1056_s26  ;;  %s1459_s23 = sld [smem:[#allocation6 + $0x7]]  ;;  %s1092_s24 = sld [smem:[#allocation2 + $0x4]] }
  0x3b   :  { %v157_v0 = vadd.f32 %v1050_v57, %v149_v45  ;;  %v192_v1 = vrot.slane %v116_v55, %v1324_v5  ;;  %v196_v3 = vrot.slane %v116_v55, %v1334_v13  ;;  %v240_v23 = vstv %s237_s3  ;;  %s1091_s25 = sld [smem:[#allocation2 + $0x3]]  ;;  %s1093_s26 = sld [smem:[#allocation2 + $0x5]] }
  0x3c   :  { %v146_v6 = vadd.f32 %v145_v59, %v143_v63  ;;  %v251_v28 = vstv %s1057_s2  ;;  %v241_v30 = vmul.f32 %v240_v23, %v1312_v2  ;;  %v255_v34 = vstv %s1382_s27  ;;  %s1481_s3 = sld [smem:[#allocation4 + $0x20]]  ;;  %s1483_s2 = sld [smem:[#allocation4 + $0x21]] }
  0x3d   :  { %v165_v7 = vadd.f32 %v1052_v58, %v157_v0  ;;  %v222_v9 = vsel %vm221_vm0, %v181_v61, %v192_v1  ;;  %v223_v14 = vsel %vm221_vm0, %v185_v62, %v196_v3  ;;  %v252_v33 = vmul.f32 %v251_v28, %v250_v27  ;;  %s1485_s27 = sld [smem:[#allocation4 + $0x22]]  ;;  %s1514_s16 = sld [smem:[#allocation4 + $0x2e]] }
  0x3e   :  { %v203_v11 = vrot.slane %v146_v6, %v1324_v5  ;;  %v207_v12 = vrot.slane %v146_v6, %v1334_v13  ;;  %v258_v35 = vstv %s1384_s28  ;;  %v266_v36 = vstv %s1386_s29  ;;  %s1487_s28 = sld [smem:[#allocation4 + $0x23]]  ;;  %s1489_s29 = sld [smem:[#allocation6 + $0x8]] }
  0x3f   :  { %v173_v10 = vadd.f32 %v1054_v4, %v165_v7  ;;  %v274_v38 = vstv %s1388_s30  ;;  %v282_v2 = vstv %s1390_s6  ;;  %v285_v39 = vstv %s1392_s7  ;;  %s1491_s30 = sld [smem:[#allocation4 + $0x24]]  ;;  %s1493_s6 = sld [smem:[#allocation4 + $0x25]] }
  0x40   :  { %v225_v16 = vsel %vm224_vm1, %v222_v9, %v203_v11  ;;  %v226_v17 = vsel %vm224_vm1, %v223_v14, %v207_v12  ;;  %v288_v40 = vstv %s1394_s8  ;;  %v296_v41 = vstv %s1396_s4  ;;  %s1495_s7 = sld [smem:[#allocation4 + $0x26]]  ;;  %s1497_s8 = sld [smem:[#allocation4 + $0x27]] }
  0x41   :  { %v176_v15 = vadd.f32 %v175_v8, %v173_v10  ;;  %v304_v42 = vstv %s1398_s9  ;;  %v315_v43 = vstv %s1400_s10  ;;  %v318_v45 = vstv %s1402_s11  ;;  %s1499_s4 = sld [smem:[#allocation4 + $0x28]]  ;;  %s1501_s9 = sld [smem:[#allocation4 + $0x29]] }
  0x42   :  { %v326_v46 = vstv %s1404_s12  ;;  %v334_v47 = vstv %s1406_s13  ;;  %v345_v48 = vstv %s1408_s14  ;;  %v348_v49 = vstv %s1410_s15  ;;  %s1503_s10 = sld [smem:[#allocation4 + $0x2a]]  ;;  %s1505_s11 = sld [smem:[#allocation4 + $0x2b]] }
  0x43   :  { %v214_v18 = vrot.slane %v176_v15, %v1324_v5  ;;  %v218_v19 = vrot.slane %v176_v15, %v1334_v13  ;;  %v356_v50 = vstv %s1415_s18  ;;  %v364_v51 = vstv %s1417_s19  ;;  %s1507_s12 = sld [smem:[#allocation4 + $0x2c]]  ;;  %s1509_s13 = sld [smem:[#allocation4 + $0x2d]] }
  0x44   :  { %s1516_s17 = sld [smem:[#allocation4 + $0x2f]]  ;;  %s1545_s0 = sld [smem:[#allocation6 + $0x9]] }
  0x45   :  { %v228_v20 = vsel %vm227_vm2, %v225_v16, %v214_v18  ;;  %v229_v21 = vsel %vm227_vm2, %v226_v17, %v218_v19  ;;  %s1552_s20 = sld [smem:[#allocation6 + $0xa]]  ;;  %s1613_s14 = sld [smem:[#allocation4 + $0x3e]] }
  0x46   :  { %1205 = vtanh.f32 %v228_v20  ;;  %s1615_s15 = sld [smem:[#allocation4 + $0x3f]]  ;;  %s1644_s18 = sld [smem:[#allocation6 + $0xd]] }
  0x47   :  { %1207 = vtanh.f32 %v229_v21  ;;  %s1651_s19 = sld [smem:[#allocation6 + $0xe]] }
  0x50   :  { %v1206_v24 = vpop.eup %1205 }
  0x51   :  { %v1208_v25 = vpop.eup %1207  ;;  %v243_v26 = vmul.f32 %v1206_v24, %v242_v22 }
  0x52   :  { %v234_v29 = vcombine.low %v1206_v24, %v1208_v25  ;;  %v244_v31 = vmul.f32 %v1208_v25, %v242_v22  ;;  %v312_v24 = vstv %s1446_s21  ;;  %s1558_s21 = sld [smem:[#allocation6 + $0xb]] }
  0x54   :  { %236 = vst [vmem:[%s1768_s5] sm:$0xff] %v234_v29  ;;  %v247_v32 = vcombine.low %v243_v26, %v244_v31 }
  0x56   :  { %v249_v37 = vadd.f32 %v247_v32, %v241_v30  ;;  %v342_v30 = vstv %s1453_s22  ;;  %s1129_s22 = sld [smem:[#allocation2 + $0x7]] }
  0x58   :  { %v1433_v44 = vadd.f32 %v252_v33, %v249_v37 }
  0x5a   :  { %v256_v52 = vmul.f32 %v255_v34, %v1433_v44  ;;  %v259_v53 = vmul.f32 %v258_v35, %v1433_v44  ;;  %v267_v54 = vmul.f32 %v266_v36, %v1433_v44  ;;  %v275_v55 = vmul.f32 %v274_v38, %v1433_v44 }
  0x5b   :  { %v286_v56 = vmul.f32 %v285_v39, %v1433_v44  ;;  %v289_v57 = vmul.f32 %v288_v40, %v1433_v44  ;;  %v297_v58 = vmul.f32 %v296_v41, %v1433_v44  ;;  %v305_v59 = vmul.f32 %v304_v42, %v1433_v44 }
  0x5c   :  { %v1060_v60 = vrot.slane %v259_v53, 9  ;;  %v1062_v61 = vrot.slane %v267_v54, 10  ;;  %v1064_v62 = vrot.slane %v275_v55, 11  ;;  %v316_v63 = vmul.f32 %v315_v43, %v1433_v44 }
  0x5d   :  { %v1068_v0 = vrot.slane %v289_v57, 9  ;;  %v1070_v1 = vrot.slane %v297_v58, 10  ;;  %v1072_v3 = vrot.slane %v305_v59, 11  ;;  %v319_v4 = vmul.f32 %v318_v45, %v1433_v44  ;;  %v1094_v57 = vld [vmem:[%s1764_s1 + $0x8] sm:$0xff] }
  0x5e   :  { %v264_v6 = vadd.f32 %v1060_v60, %v256_v52  ;;  %v327_v7 = vmul.f32 %v326_v46, %v1433_v44  ;;  %v335_v8 = vmul.f32 %v334_v47, %v1433_v44  ;;  %v346_v9 = vmul.f32 %v345_v48, %v1433_v44 }
  0x5f   :  { %v294_v10 = vadd.f32 %v1068_v0, %v286_v56  ;;  %v1076_v11 = vrot.slane %v319_v4, 9  ;;  %v349_v12 = vmul.f32 %v348_v49, %v1433_v44  ;;  %v357_v14 = vmul.f32 %v356_v50, %v1433_v44 }
  0x60   :  { %v272_v15 = vadd.f32 %v1062_v61, %v264_v6  ;;  %v1078_v16 = vrot.slane %v327_v7, 10  ;;  %v1080_v17 = vrot.slane %v335_v8, 11  ;;  %v365_v18 = vmul.f32 %v364_v51, %v1433_v44 }
  0x61   :  { %v302_v19 = vadd.f32 %v1070_v1, %v294_v10  ;;  %v324_v20 = vadd.f32 %v1076_v11, %v316_v63  ;;  %v1084_v21 = vrot.slane %v349_v12, 9  ;;  %v1086_v22 = vrot.slane %v357_v14, 10 }
  0x62   :  { %v280_v23 = vadd.f32 %v1064_v62, %v272_v15  ;;  %v1088_v28 = vrot.slane %v365_v18, 11  ;;  %v372_v34 = vstv %s1459_s23  ;;  %v437_v52 = vstv %s1092_s24  ;;  %s1128_s23 = sld [smem:[#allocation2 + $0x6]]  ;;  %s1130_s24 = sld [smem:[#allocation2 + $0x8]] }
  0x63   :  { %v310_v25 = vadd.f32 %v1072_v3, %v302_v19  ;;  %v332_v26 = vadd.f32 %v1078_v16, %v324_v20  ;;  %v354_v27 = vadd.f32 %v1084_v21, %v346_v9  ;;  %v435_v53 = vstv %s1091_s25  ;;  %s1580_s25 = sld [smem:[#allocation4 + $0x30]] }
  0x64   :  { %v283_v29 = vadd.f32 %v282_v2, %v280_v23  ;;  %v447_v58 = vstv %s1093_s26  ;;  %v436_v60 = vmul.f32 %v435_v53, %v1433_v44  ;;  %v451_v0 = vstv %s1481_s3  ;;  %s1582_s26 = sld [smem:[#allocation4 + $0x31]]  ;;  %s1584_s3 = sld [smem:[#allocation4 + $0x32]] }
  0x65   :  { %v313_v31 = vadd.f32 %v312_v24, %v310_v25  ;;  %v340_v32 = vadd.f32 %v1080_v17, %v332_v26  ;;  %v362_v33 = vadd.f32 %v1086_v22, %v354_v27  ;;  %v448_v63 = vmul.f32 %v1094_v57, %v447_v58 }
  0x66   :  { %v378_v35 = vrot.slane %v283_v29, %v1324_v5  ;;  %v382_v36 = vrot.slane %v283_v29, %v1334_v13  ;;  %v454_v1 = vstv %s1483_s2  ;;  %v462_v3 = vstv %s1485_s27  ;;  %s1586_s2 = sld [smem:[#allocation4 + $0x33]]  ;;  %s1588_s27 = sld [smem:[#allocation6 + $0xc]] }
  0x67   :  { %v343_v37 = vadd.f32 %v342_v30, %v340_v32  ;;  %v370_v38 = vadd.f32 %v1088_v28, %v362_v33  ;;  %v389_v39 = vrot.slane %v313_v31, %v1324_v5  ;;  %v393_v40 = vrot.slane %v313_v31, %v1334_v13 }
  0x68   :  { %v470_v6 = vstv %s1487_s28  ;;  %v478_v44 = vstv %s1489_s29  ;;  %v481_v7 = vstv %s1491_s30  ;;  %v484_v8 = vstv %s1493_s6  ;;  %s1590_s28 = sld [smem:[#allocation4 + $0x34]]  ;;  %s1592_s29 = sld [smem:[#allocation4 + $0x35]] }
  0x69   :  { %v373_v41 = vadd.f32 %v372_v34, %v370_v38  ;;  %v400_v42 = vrot.slane %v343_v37, %v1324_v5  ;;  %v404_v2 = vrot.slane %v343_v37, %v1334_v13  ;;  %v418_v43 = vsel %vm221_vm0, %v378_v35, %v389_v39  ;;  %s1594_s30 = sld [smem:[#allocation4 + $0x36]]  ;;  %s1596_s6 = sld [smem:[#allocation4 + $0x37]] }
  0x6a   :  { %v419_v45 = vsel %vm221_vm0, %v382_v36, %v393_v40  ;;  %v492_v9 = vstv %s1495_s7  ;;  %v500_v10 = vstv %s1497_s8  ;;  %v511_v11 = vstv %s1499_s4  ;;  %s1598_s7 = sld [smem:[#allocation4 + $0x38]]  ;;  %s1600_s8 = sld [smem:[#allocation4 + $0x39]] }
  0x6b   :  { %v411_v46 = vrot.slane %v373_v41, %v1324_v5  ;;  %v415_v47 = vrot.slane %v373_v41, %v1334_v13  ;;  %v420_v48 = vsel %vm224_vm1, %v418_v43, %v400_v42  ;;  %v421_v49 = vsel %vm224_vm1, %v419_v45, %v404_v2  ;;  %s1602_s4 = sld [smem:[#allocation4 + $0x3a]] }
  0x6c   :  { %v514_v14 = vstv %s1501_s9  ;;  %v522_v15 = vstv %s1503_s10  ;;  %v530_v16 = vstv %s1505_s11  ;;  %v541_v17 = vstv %s1507_s12  ;;  %s1604_s9 = sld [smem:[#allocation4 + $0x3b]]  ;;  %s1606_s10 = sld [smem:[#allocation4 + $0x3c]] }
  0x6d   :  { %v422_v50 = vsel %vm227_vm2, %v420_v48, %v411_v46  ;;  %v423_v51 = vsel %vm227_vm2, %v421_v49, %v415_v47  ;;  %v544_v18 = vstv %s1509_s13  ;;  %v552_v19 = vstv %s1514_s16  ;;  %s1608_s11 = sld [smem:[#allocation4 + $0x3d]]  ;;  %s1712_s12 = sld [smem:[#allocation4 + $0x4e]] }
  0x6e   :  { %1209 = vtanh.f32 %v422_v50  ;;  %v560_v20 = vstv %s1516_s17  ;;  %s1714_s13 = sld [smem:[#allocation4 + $0x4f]]  ;;  %s1739_s16 = sld [smem:[#allocation6 + $0x12]] }
  0x6f   :  { %1211 = vtanh.f32 %v423_v51  ;;  %s1741_s17 = sld [smem:[#allocation6 + $0x13]] }
  0x78   :  { %v1210_v54 = vpop.eup %1209 }
  0x79   :  { %v1212_v55 = vpop.eup %1211  ;;  %v438_v56 = vmul.f32 %v1210_v54, %v437_v52 }
  0x7a   :  { %v428_v59 = vcombine.low %v1210_v54, %v1212_v55  ;;  %v439_v61 = vmul.f32 %v1212_v55, %v437_v52  ;;  %v508_v54 = vstv %s1545_s0  ;;  %s1657_s0 = sld [smem:[#allocation6 + $0xf]] }
  0x7c   :  { %1090 = vst [vmem:[%s1768_s5 + $0x8] sm:$0xff] %v428_v59  ;;  %v442_v62 = vcombine.low %v438_v56, %v439_v61 }
  0x7e   :  { %v444_v4 = vadd.f32 %v442_v62, %v436_v60  ;;  %v538_v60 = vstv %s1552_s20  ;;  %s1166_s20 = sld [smem:[#allocation2 + $0xa]] }
  0x80   :  { %v1532_v12 = vadd.f32 %v448_v63, %v444_v4 }
  0x82   :  { %v452_v21 = vmul.f32 %v451_v0, %v1532_v12  ;;  %v455_v22 = vmul.f32 %v454_v1, %v1532_v12  ;;  %v463_v23 = vmul.f32 %v462_v3, %v1532_v12  ;;  %v471_v24 = vmul.f32 %v470_v6, %v1532_v12 }
  0x83   :  { %v482_v25 = vmul.f32 %v481_v7, %v1532_v12  ;;  %v485_v26 = vmul.f32 %v484_v8, %v1532_v12  ;;  %v493_v27 = vmul.f32 %v492_v9, %v1532_v12  ;;  %v501_v28 = vmul.f32 %v500_v10, %v1532_v12 }
  0x84   :  { %v1097_v29 = vrot.slane %v455_v22, 9  ;;  %v1099_v30 = vrot.slane %v463_v23, 10  ;;  %v1101_v31 = vrot.slane %v471_v24, 11  ;;  %v512_v32 = vmul.f32 %v511_v11, %v1532_v12 }
  0x85   :  { %v1105_v33 = vrot.slane %v485_v26, 9  ;;  %v1107_v34 = vrot.slane %v493_v27, 10  ;;  %v1109_v35 = vrot.slane %v501_v28, 11  ;;  %v515_v36 = vmul.f32 %v514_v14, %v1532_v12  ;;  %v1131_v26 = vld [vmem:[%s1764_s1 + $0x10] sm:$0xff] }
  0x86   :  { %v460_v37 = vadd.f32 %v1097_v29, %v452_v21  ;;  %v523_v38 = vmul.f32 %v522_v15, %v1532_v12  ;;  %v531_v39 = vmul.f32 %v530_v16, %v1532_v12  ;;  %v542_v40 = vmul.f32 %v541_v17, %v1532_v12 }
  0x87   :  { %v490_v41 = vadd.f32 %v1105_v33, %v482_v25  ;;  %v1113_v42 = vrot.slane %v515_v36, 9  ;;  %v545_v2 = vmul.f32 %v544_v18, %v1532_v12  ;;  %v553_v43 = vmul.f32 %v552_v19, %v1532_v12 }
  0x88   :  { %v468_v45 = vadd.f32 %v1099_v30, %v460_v37  ;;  %v1115_v46 = vrot.slane %v523_v38, 10  ;;  %v1117_v47 = vrot.slane %v531_v39, 11  ;;  %v561_v48 = vmul.f32 %v560_v20, %v1532_v12 }
  0x89   :  { %v498_v49 = vadd.f32 %v1107_v34, %v490_v41  ;;  %v520_v50 = vadd.f32 %v1113_v42, %v512_v32  ;;  %v1121_v51 = vrot.slane %v545_v2, 9  ;;  %v1123_v52 = vrot.slane %v553_v43, 10 }
  0x8a   :  { %v476_v53 = vadd.f32 %v1101_v31, %v468_v45  ;;  %v1125_v58 = vrot.slane %v561_v48, 11  ;;  %v568_v0 = vstv %s1558_s21  ;;  %v633_v21 = vstv %s1129_s22  ;;  %s1165_s21 = sld [smem:[#allocation2 + $0x9]]  ;;  %s1167_s22 = sld [smem:[#allocation2 + $0xb]] }
  0x8b   :  { %v506_v55 = vadd.f32 %v1109_v35, %v498_v49  ;;  %v528_v56 = vadd.f32 %v1115_v46, %v520_v50  ;;  %v550_v57 = vadd.f32 %v1121_v51, %v542_v40  ;;  %v631_v22 = vstv %s1128_s23  ;;  %s1679_s23 = sld [smem:[#allocation4 + $0x40]] }
  0x8c   :  { %v479_v59 = vadd.f32 %v478_v44, %v476_v53  ;;  %v643_v27 = vstv %s1130_s24  ;;  %v632_v29 = vmul.f32 %v631_v22, %v1532_v12  ;;  %v647_v33 = vstv %s1580_s25  ;;  %s1681_s24 = sld [smem:[#allocation4 + $0x41]]  ;;  %s1683_s25 = sld [smem:[#allocation4 + $0x42]] }
  0x8d   :  { %v509_v61 = vadd.f32 %v508_v54, %v506_v55  ;;  %v536_v62 = vadd.f32 %v1117_v47, %v528_v56  ;;  %v558_v63 = vadd.f32 %v1123_v52, %v550_v57  ;;  %v644_v32 = vmul.f32 %v1131_v26, %v643_v27 }
  0x8e   :  { %v574_v1 = vrot.slane %v479_v59, %v1324_v5  ;;  %v578_v3 = vrot.slane %v479_v59, %v1334_v13  ;;  %v650_v34 = vstv %s1582_s26  ;;  %v658_v35 = vstv %s1584_s3  ;;  %s1685_s26 = sld [smem:[#allocation4 + $0x43]]  ;;  %s1687_s3 = sld [smem:[#allocation6 + $0x10]] }
  0x8f   :  { %v539_v4 = vadd.f32 %v538_v60, %v536_v62  ;;  %v566_v6 = vadd.f32 %v1125_v58, %v558_v63  ;;  %v585_v7 = vrot.slane %v509_v61, %v1324_v5  ;;  %v589_v8 = vrot.slane %v509_v61, %v1334_v13 }
  0x90   :  { %v666_v37 = vstv %s1586_s2  ;;  %v674_v12 = vstv %s1588_s27  ;;  %v677_v38 = vstv %s1590_s28  ;;  %v680_v39 = vstv %s1592_s29  ;;  %s1689_s2 = sld [smem:[#allocation4 + $0x44]]  ;;  %s1691_s27 = sld [smem:[#allocation4 + $0x45]] }
  0x91   :  { %v569_v9 = vadd.f32 %v568_v0, %v566_v6  ;;  %v596_v10 = vrot.slane %v539_v4, %v1324_v5  ;;  %v600_v44 = vrot.slane %v539_v4, %v1334_v13  ;;  %v614_v11 = vsel %vm221_vm0, %v574_v1, %v585_v7  ;;  %s1693_s28 = sld [smem:[#allocation4 + $0x46]]  ;;  %s1695_s29 = sld [smem:[#allocation4 + $0x47]] }
  0x92   :  { %v615_v14 = vsel %vm221_vm0, %v578_v3, %v589_v8  ;;  %v688_v40 = vstv %s1594_s30  ;;  %v696_v41 = vstv %s1596_s6  ;;  %v707_v42 = vstv %s1598_s7  ;;  %s1697_s30 = sld [smem:[#allocation4 + $0x48]]  ;;  %s1699_s6 = sld [smem:[#allocation4 + $0x49]] }
  0x93   :  { %v607_v15 = vrot.slane %v569_v9, %v1324_v5  ;;  %v611_v16 = vrot.slane %v569_v9, %v1334_v13  ;;  %v616_v17 = vsel %vm224_vm1, %v614_v11, %v596_v10  ;;  %v617_v18 = vsel %vm224_vm1, %v615_v14, %v600_v44  ;;  %s1701_s7 = sld [smem:[#allocation4 + $0x4a]] }
  0x94   :  { %v710_v43 = vstv %s1600_s8  ;;  %v718_v45 = vstv %s1602_s4  ;;  %v726_v46 = vstv %s1604_s9  ;;  %v737_v47 = vstv %s1606_s10  ;;  %s1703_s8 = sld [smem:[#allocation4 + $0x4b]]  ;;  %s1705_s4 = sld [smem:[#allocation4 + $0x4c]] }
  0x95   :  { %v618_v19 = vsel %vm227_vm2, %v616_v17, %v607_v15  ;;  %v619_v20 = vsel %vm227_vm2, %v617_v18, %v611_v16  ;;  %v740_v48 = vstv %s1608_s11  ;;  %v748_v49 = vstv %s1613_s14  ;;  %s1707_s9 = sld [smem:[#allocation4 + $0x4d]] }
  0x96   :  { %1213 = vtanh.f32 %v618_v19  ;;  %v756_v50 = vstv %s1615_s15 }
  0x97   :  { %1215 = vtanh.f32 %v619_v20 }
  0xa0   :  { %v1214_v23 = vpop.eup %1213 }
  0xa1   :  { %v1216_v24 = vpop.eup %1215  ;;  %v634_v25 = vmul.f32 %v1214_v23, %v633_v21 }
  0xa2   :  { %v624_v28 = vcombine.low %v1214_v23, %v1216_v24  ;;  %v635_v30 = vmul.f32 %v1216_v24, %v633_v21  ;;  %v704_v23 = vstv %s1644_s18 }
  0xa4   :  { %1127 = vst [vmem:[%s1768_s5 + $0x10] sm:$0xff] %v624_v28  ;;  %v638_v31 = vcombine.low %v634_v25, %v635_v30 }
  0xa6   :  { %v640_v36 = vadd.f32 %v638_v31, %v632_v29  ;;  %v734_v29 = vstv %s1651_s19 }
  0xa8   :  { %v1631_v2 = vadd.f32 %v644_v32, %v640_v36 }
  0xaa   :  { %v648_v51 = vmul.f32 %v647_v33, %v1631_v2  ;;  %v651_v52 = vmul.f32 %v650_v34, %v1631_v2  ;;  %v659_v53 = vmul.f32 %v658_v35, %v1631_v2  ;;  %v667_v54 = vmul.f32 %v666_v37, %v1631_v2 }
  0xab   :  { %v678_v55 = vmul.f32 %v677_v38, %v1631_v2  ;;  %v681_v56 = vmul.f32 %v680_v39, %v1631_v2  ;;  %v689_v57 = vmul.f32 %v688_v40, %v1631_v2  ;;  %v697_v58 = vmul.f32 %v696_v41, %v1631_v2 }
  0xac   :  { %v1134_v59 = vrot.slane %v651_v52, 9  ;;  %v1136_v60 = vrot.slane %v659_v53, 10  ;;  %v1138_v61 = vrot.slane %v667_v54, 11  ;;  %v708_v62 = vmul.f32 %v707_v42, %v1631_v2 }
  0xad   :  { %v1142_v63 = vrot.slane %v681_v56, 9  ;;  %v1144_v0 = vrot.slane %v689_v57, 10  ;;  %v1146_v1 = vrot.slane %v697_v58, 11  ;;  %v711_v3 = vmul.f32 %v710_v43, %v1631_v2  ;;  %v1168_v56 = vld [vmem:[%s1764_s1 + $0x18] sm:$0xff]  ;;  %s1737_s1 = sld [smem:[#allocation6 + $0x11]] }
  0xae   :  { %v656_v4 = vadd.f32 %v1134_v59, %v648_v51  ;;  %v719_v6 = vmul.f32 %v718_v45, %v1631_v2  ;;  %v727_v7 = vmul.f32 %v726_v46, %v1631_v2  ;;  %v738_v8 = vmul.f32 %v737_v47, %v1631_v2 }
  0xaf   :  { %v686_v9 = vadd.f32 %v1142_v63, %v678_v55  ;;  %v1150_v10 = vrot.slane %v711_v3, 9  ;;  %v741_v44 = vmul.f32 %v740_v48, %v1631_v2  ;;  %v749_v11 = vmul.f32 %v748_v49, %v1631_v2 }
  0xb0   :  { %v664_v14 = vadd.f32 %v1136_v60, %v656_v4  ;;  %v1152_v15 = vrot.slane %v719_v6, 10  ;;  %v1154_v16 = vrot.slane %v727_v7, 11  ;;  %v757_v17 = vmul.f32 %v756_v50, %v1631_v2 }
  0xb1   :  { %v694_v18 = vadd.f32 %v1144_v0, %v686_v9  ;;  %v716_v19 = vadd.f32 %v1150_v10, %v708_v62  ;;  %v1158_v20 = vrot.slane %v741_v44, 9  ;;  %v1160_v21 = vrot.slane %v749_v11, 10 }
  0xb2   :  { %v672_v22 = vadd.f32 %v1138_v61, %v664_v14  ;;  %v1162_v27 = vrot.slane %v757_v17, 11  ;;  %v764_v33 = vstv %s1657_s0  ;;  %v829_v51 = vstv %s1166_s20 }
  0xb3   :  { %v702_v24 = vadd.f32 %v1146_v1, %v694_v18  ;;  %v724_v25 = vadd.f32 %v1152_v15, %v716_v19  ;;  %v746_v26 = vadd.f32 %v1158_v20, %v738_v8  ;;  %v827_v52 = vstv %s1165_s21 }
  0xb4   :  { %v675_v28 = vadd.f32 %v674_v12, %v672_v22  ;;  %v839_v57 = vstv %s1167_s22  ;;  %v828_v59 = vmul.f32 %v827_v52, %v1631_v2  ;;  %v843_v63 = vstv %s1679_s23 }
  0xb5   :  { %v705_v30 = vadd.f32 %v704_v23, %v702_v24  ;;  %v732_v31 = vadd.f32 %v1154_v16, %v724_v25  ;;  %v754_v32 = vadd.f32 %v1160_v21, %v746_v26  ;;  %v840_v62 = vmul.f32 %v1168_v56, %v839_v57 }
  0xb6   :  { %v770_v34 = vrot.slane %v675_v28, %v1324_v5  ;;  %v774_v35 = vrot.slane %v675_v28, %v1334_v13  ;;  %v846_v0 = vstv %s1681_s24  ;;  %v854_v1 = vstv %s1683_s25 }
  0xb7   :  { %v735_v36 = vadd.f32 %v734_v29, %v732_v31  ;;  %v762_v37 = vadd.f32 %v1162_v27, %v754_v32  ;;  %v781_v38 = vrot.slane %v705_v30, %v1324_v5  ;;  %v785_v39 = vrot.slane %v705_v30, %v1334_v13 }
  0xb8   :  { %v862_v4 = vstv %s1685_s26  ;;  %v870_v2 = vstv %s1687_s3  ;;  %v873_v6 = vstv %s1689_s2  ;;  %v876_v7 = vstv %s1691_s27 }
  0xb9   :  { %v765_v40 = vadd.f32 %v764_v33, %v762_v37  ;;  %v792_v41 = vrot.slane %v735_v36, %v1324_v5  ;;  %v796_v12 = vrot.slane %v735_v36, %v1334_v13  ;;  %v810_v42 = vsel %vm221_vm0, %v770_v34, %v781_v38 }
  0xba   :  { %v811_v43 = vsel %vm221_vm0, %v774_v35, %v785_v39  ;;  %v884_v8 = vstv %s1693_s28  ;;  %v892_v9 = vstv %s1695_s29  ;;  %v903_v10 = vstv %s1697_s30 }
  0xbb   :  { %v803_v45 = vrot.slane %v765_v40, %v1324_v5  ;;  %v807_v46 = vrot.slane %v765_v40, %v1334_v13  ;;  %v812_v47 = vsel %vm224_vm1, %v810_v42, %v792_v41  ;;  %v813_v48 = vsel %vm224_vm1, %v811_v43, %v796_v12 }
  0xbc   :  { %v906_v11 = vstv %s1699_s6  ;;  %v914_v14 = vstv %s1701_s7  ;;  %v922_v15 = vstv %s1703_s8  ;;  %v933_v16 = vstv %s1705_s4 }
  0xbd   :  { %v814_v49 = vsel %vm227_vm2, %v812_v47, %v803_v45  ;;  %v815_v50 = vsel %vm227_vm2, %v813_v48, %v807_v46  ;;  %v936_v17 = vstv %s1707_s9  ;;  %v944_v18 = vstv %s1712_s12 }
  0xbe   :  { %1217 = vtanh.f32 %v814_v49  ;;  %v952_v19 = vstv %s1714_s13 }
  0xbf   :  { %1219 = vtanh.f32 %v815_v50 }
  0xc8   :  { %v1218_v53 = vpop.eup %1217 }
  0xc9   :  { %v1220_v54 = vpop.eup %1219  ;;  %v830_v55 = vmul.f32 %v1218_v53, %v829_v51 }
  0xca   :  { %v820_v58 = vcombine.low %v1218_v53, %v1220_v54  ;;  %v831_v60 = vmul.f32 %v1220_v54, %v829_v51  ;;  %v900_v53 = vstv %s1737_s1 }
  0xcc   :  { %1164 = vst [vmem:[%s1768_s5 + $0x18] sm:$0xff] %v820_v58  ;;  %v834_v61 = vcombine.low %v830_v55, %v831_v60 }
  0xce   :  { %v836_v3 = vadd.f32 %v834_v61, %v828_v59  ;;  %v930_v59 = vstv %s1739_s16 }
  0xd0   :  { %v841_v44 = vadd.f32 %v840_v62, %v836_v3 }
  0xd2   :  { %v844_v20 = vmul.f32 %v843_v63, %v841_v44  ;;  %v847_v21 = vmul.f32 %v846_v0, %v841_v44  ;;  %v855_v22 = vmul.f32 %v854_v1, %v841_v44  ;;  %v863_v23 = vmul.f32 %v862_v4, %v841_v44 }
  0xd3   :  { %v874_v24 = vmul.f32 %v873_v6, %v841_v44  ;;  %v877_v25 = vmul.f32 %v876_v7, %v841_v44  ;;  %v885_v26 = vmul.f32 %v884_v8, %v841_v44  ;;  %v893_v27 = vmul.f32 %v892_v9, %v841_v44 }
  0xd4   :  { %v1171_v28 = vrot.slane %v847_v21, 9  ;;  %v1173_v29 = vrot.slane %v855_v22, 10  ;;  %v1175_v30 = vrot.slane %v863_v23, 11  ;;  %v904_v31 = vmul.f32 %v903_v10, %v841_v44 }
  0xd5   :  { %v1179_v32 = vrot.slane %v877_v25, 9  ;;  %v1181_v33 = vrot.slane %v885_v26, 10  ;;  %v1183_v34 = vrot.slane %v893_v27, 11  ;;  %v907_v35 = vmul.f32 %v906_v11, %v841_v44 }
  0xd6   :  { %v852_v36 = vadd.f32 %v1171_v28, %v844_v20  ;;  %v915_v37 = vmul.f32 %v914_v14, %v841_v44  ;;  %v923_v38 = vmul.f32 %v922_v15, %v841_v44  ;;  %v934_v39 = vmul.f32 %v933_v16, %v841_v44 }
  0xd7   :  { %v882_v40 = vadd.f32 %v1179_v32, %v874_v24  ;;  %v1187_v41 = vrot.slane %v907_v35, 9  ;;  %v937_v12 = vmul.f32 %v936_v17, %v841_v44  ;;  %v945_v42 = vmul.f32 %v944_v18, %v841_v44 }
  0xd8   :  { %v860_v43 = vadd.f32 %v1173_v29, %v852_v36  ;;  %v1189_v45 = vrot.slane %v915_v37, 10  ;;  %v1191_v46 = vrot.slane %v923_v38, 11  ;;  %v953_v47 = vmul.f32 %v952_v19, %v841_v44 }
  0xd9   :  { %v890_v48 = vadd.f32 %v1181_v33, %v882_v40  ;;  %v912_v49 = vadd.f32 %v1187_v41, %v904_v31  ;;  %v1195_v50 = vrot.slane %v937_v12, 9  ;;  %v1197_v51 = vrot.slane %v945_v42, 10 }
  0xda   :  { %v868_v52 = vadd.f32 %v1175_v30, %v860_v43  ;;  %v1199_v57 = vrot.slane %v953_v47, 11  ;;  %v960_v63 = vstv %s1741_s17 }
  0xdb   :  { %v898_v54 = vadd.f32 %v1183_v34, %v890_v48  ;;  %v920_v55 = vadd.f32 %v1189_v45, %v912_v49  ;;  %v942_v56 = vadd.f32 %v1195_v50, %v934_v39 }
  0xdc   :  { %v871_v58 = vadd.f32 %v870_v2, %v868_v52 }
  0xdd   :  { %v901_v60 = vadd.f32 %v900_v53, %v898_v54  ;;  %v928_v61 = vadd.f32 %v1191_v46, %v920_v55  ;;  %v950_v62 = vadd.f32 %v1197_v51, %v942_v56 }
  0xde   :  { %v966_v0 = vrot.slane %v871_v58, %v1324_v5  ;;  %v970_v1 = vrot.slane %v871_v58, %v1334_v13 }
  0xdf   :  { %v931_v3 = vadd.f32 %v930_v59, %v928_v61  ;;  %v958_v4 = vadd.f32 %v1199_v57, %v950_v62  ;;  %v977_v6 = vrot.slane %v901_v60, %v1324_v5  ;;  %v981_v7 = vrot.slane %v901_v60, %v1334_v13 }
  0xe1   :  { %v961_v8 = vadd.f32 %v960_v63, %v958_v4  ;;  %v988_v9 = vrot.slane %v931_v3, %v1324_v5  ;;  %v992_v2 = vrot.slane %v931_v3, %v1334_v13  ;;  %v1006_v10 = vsel %vm221_vm0, %v966_v0, %v977_v6 }
  0xe2   :  { %v1007_v44 = vsel %vm221_vm0, %v970_v1, %v981_v7 }
  0xe3   :  { %v999_v11 = vrot.slane %v961_v8, %v1324_v5  ;;  %v1003_v14 = vrot.slane %v961_v8, %v1334_v13  ;;  %v1008_v15 = vsel %vm224_vm1, %v1006_v10, %v988_v9  ;;  %v1009_v16 = vsel %vm224_vm1, %v1007_v44, %v992_v2 }
  0xe5   :  { %v1010_v17 = vsel %vm227_vm2, %v1008_v15, %v999_v11  ;;  %v1011_v18 = vsel %vm227_vm2, %v1009_v16, %v1003_v14 }
  0xe6   :  { %1221 = vtanh.f32 %v1010_v17 }
  0xe7   :  { %1223 = vtanh.f32 %v1011_v18 }
  0xf0   :  { %v1222_v19 = vpop.eup %1221 }
  0xf1   :  { %v1224_v20 = vpop.eup %1223 }
  0xf2   :  { %v1016_v21 = vcombine.low %v1222_v19, %v1224_v20 }
  0xf4   :  { %1201 = vst [vmem:[%s1768_s5 + $0x20] sm:$0xff] %v1016_v21 }
  0xf5   :  { %1024 = vsyncpa [#allocation3], 1 }
  0xf6   :  { %1025 = vsyncpa [#allocation5], 1 }

</bundles_post_ra>
